<compile_context>
chip_gen: v6e
topology: v6e:2x2x1
jax: 0.10.0
libtpu: 0.0.40
codegen_flags: <defaults>
</compile_context>

<pallas_src>
import functools

import jax
import jax.numpy as jnp
from jax import lax
from jax.experimental import pallas as pl
from jax.experimental.pallas import tpu as pltpu

VMEM = pl.BlockSpec(memory_space=pltpu.MemorySpace.VMEM)

# (relation, source ntype = Linear input, ntype whose out_dim sets output width)
_RELATIONS = (
    ('crew', 'crew', 'crew'),
    ('plane', 'plane', 'plane'),
    ('c_in', 'crew', 'state'),
    ('repairing', 'crew', 'plane'),
    ('p_in', 'plane', 'state'),
    ('p_to', 'plane', 'value'),
    ('repaired_by', 'plane', 'crew'),
    ('s_in', 'state', 'state'),
    ('s_to', 'state', 'value'),
    ('v_to', 'value', 'value'),
)

_NTYPES = ('crew', 'plane', 'state', 'value')

# NT matmul: contract the last dim of both operands (flash-attention style).
_NT_DIMS = (((1,), (1,)), ((), ()))


# ---------------------------------------------------------------------------
# The single fused forward kernel
# ---------------------------------------------------------------------------
def _fused_kernel(*refs, num_heads, d_state, neg_slope, use_relu):
    # ---- unpack refs (order defined once, in multi_hetero_gat_forward) ----
    x_crew, x_plane, x_state, x_value = refs[0:4]
    wb = refs[4:4 + 2 * len(_RELATIONS)]
    a_c_src, a_c_dst, a_p_src, a_p_dst = refs[24:28]
    adj_c_in, adj_p_in, adj_rb, adj_rp, adj_pt, adj_st = refs[28:34]
    o_crew, o_plane, o_state, o_value = refs[34:38]

    w_ref = {rel: wb[2 * i] for i, (rel, _, _) in enumerate(_RELATIONS)}
    b_ref = {rel: wb[2 * i + 1] for i, (rel, _, _) in enumerate(_RELATIONS)}

    relu = (lambda t: jnp.maximum(t, 0.0)) if use_relu else (lambda t: t)

    # ---- (1) all 10 relation Linears: bf16 x bf16 -> f32, + f32 bias -------
    # Weights are pre-transposed (in_dim, H*out), head-major columns, so no
    # in-kernel transpose and no lane-unaligned slicing of a concatenated Wh.
    xv = {'crew': x_crew[...], 'plane': x_plane[...],
          'state': x_state[...], 'value': x_value[...]}
    wh = {}
    for rel, src, _ in _RELATIONS:
        wh[rel] = jnp.dot(xv[src], w_ref[rel][...],
                          preferred_element_type=jnp.float32) + b_ref[rel][...]
    # (ft_s_in / ft_v_to aggregations of the reference are dead -> skipped.)

    # ---- (2) crew / plane / value: copy_src + sum aggregation + combine ----
    # adjT is dst-major (N_dst, N_src):  ft[dst] = sum_{src in N(dst)} Wh[src]
    # = adjT @ Wh.  bf16 MXU operands, f32 accumulate.  Adding an all-zero
    # aggregate when a relation has no edges matches the reference's
    # number_of_edges() > 0 guard.
    def agg(adj_ref, wh_src):
        return jnp.dot(adj_ref[...], wh_src.astype(jnp.bfloat16),
                       preferred_element_type=jnp.float32)

    o_crew[...] = relu(wh['crew'] + agg(adj_rb, wh['repaired_by']))
    o_plane[...] = relu(wh['plane'] + agg(adj_rp, wh['repairing']))
    o_value[...] = relu(wh['v_to'] + agg(adj_pt, wh['p_to'])
                        + agg(adj_st, wh['s_to']))

    # ---- (3) state nodes: GAT over c_in and p_in + self term + ReLU --------
    adjc = adj_c_in[...].astype(jnp.float32)            # (Nst, Ncr) 0/1
    adjp = adj_p_in[...].astype(jnp.float32)            # (Nst, Npl) 0/1
    bias_c = (adjc - 1.0) * 1e30                        # 0 on edges, -1e30 off
    bias_p = (adjp - 1.0) * 1e30

    # Source logits come straight off the MXU in (H, N_src) orientation
    # (NT dot_general) -- no XLU transpose.  Dst logits are (N_dst, H).
    attn_sc = lax.dot_general(a_c_src[...], wh['c_in'], _NT_DIMS,
                              preferred_element_type=jnp.float32)   # (H, Ncr)
    attn_sp = lax.dot_general(a_p_src[...], wh['p_in'], _NT_DIMS,
                              preferred_element_type=jnp.float32)   # (H, Npl)
    attn_dc = lax.dot_general(wh['s_in'], a_c_dst[...], _NT_DIMS,
                              preferred_element_type=jnp.float32)   # (Nst, H)
    attn_dp = lax.dot_general(wh['s_in'], a_p_dst[...], _NT_DIMS,
                              preferred_element_type=jnp.float32)   # (Nst, H)

    wh_c_bf = wh['c_in'].astype(jnp.bfloat16)
    wh_p_bf = wh['p_in'].astype(jnp.bfloat16)

    for h in range(num_heads):
        lo = h * d_state

        def head_alpha(attn_d, attn_s, bias, adjf):
            # dst-major edge logits: e[j, i] = attn_dst[j, h] + attn_src[h, i]
            e = attn_d[:, h:h + 1] + attn_s[h:h + 1, :]              # (Nd, Ns)
            e = jnp.where(e > 0, e, neg_slope * e) + bias            # LeakyReLU + mask
            m = jnp.max(e, axis=-1, keepdims=True)                   # lane reduce
            p = jnp.exp(e - m) * adjf                                # zero non-edges
            den = jnp.sum(p, axis=-1, keepdims=True)
            den = jnp.where(den == 0.0, 1.0, den)                    # isolated dst -> 0
            return p * (1.0 / den)                                   # exact normalization

        alpha_c = head_alpha(attn_dc, attn_sc, bias_c, adjc)         # (Nst, Ncr)
        alpha_p = head_alpha(attn_dp, attn_sp, bias_p, adjp)         # (Nst, Npl)

        # self term + ft_c_in + ft_p_in folded into one f32 accumulator
        acc = wh['s_in'][:, lo:lo + d_state]
        acc = acc + jnp.dot(alpha_c.astype(jnp.bfloat16),
                            wh_c_bf[:, lo:lo + d_state],
                            preferred_element_type=jnp.float32)
        acc = acc + jnp.dot(alpha_p.astype(jnp.bfloat16),
                            wh_p_bf[:, lo:lo + d_state],
                            preferred_element_type=jnp.float32)
        o_state[:, lo:lo + d_state] = relu(acc)


# ---------------------------------------------------------------------------
# Forward pass wrapper (single pallas_call)
# ---------------------------------------------------------------------------
def multi_hetero_gat_forward(params, feats, adjT, num_heads, out_dim, merge='cat'):
    """adjT[etype]: dst-major dense adjacency mask of shape (N_dst, N_src), bf16/f32."""
    use_relu = (merge == 'cat')        # MultiHeteroGATLayer: ReLU only for 'cat'
    f16 = lambda a: a.astype(jnp.bfloat16)     # MXU operands in bf16, f32 accumulate

    n = {nt: feats[nt].shape[0] for nt in _NTYPES}

    args = [f16(feats[nt]) for nt in _NTYPES]
    for rel, _, _ in _RELATIONS:
        args += [f16(params['w'][rel]), params['b'][rel]]
    args += [params['attn'][k] for k in ('c_in_src', 'c_in_dst', 'p_in_src', 'p_in_dst')]
    args += [f16(adjT[e]) for e in ('c_in', 'p_in', 'repaired_by', 'repairing',
                                    'p_to', 's_to')]

    out_shape = tuple(
        jax.ShapeDtypeStruct((n[nt], num_heads * out_dim[nt]), jnp.float32)
        for nt in _NTYPES)

    kern = functools.partial(_fused_kernel, num_heads=num_heads,
                             d_state=out_dim['state'], neg_slope=0.2,
                             use_relu=use_relu)

    h_crew, h_plane, h_state, h_value = pl.pallas_call(
        kern,
        out_shape=out_shape,
        in_specs=[VMEM] * len(args),
        out_specs=(VMEM, VMEM, VMEM, VMEM),
        compiler_params=pltpu.CompilerParams(vmem_limit_bytes=48 * 1024 * 1024),
    )(*args)

    h = {'crew': h_crew, 'plane': h_plane, 'state': h_state, 'value': h_value}
    if merge == 'cat':
        return h                                   # already flat, head-major
    return {nt: jnp.mean(v.reshape(v.shape[0], num_heads, -1), axis=1)
            for nt, v in h.items()}


# ---------------------------------------------------------------------------
# Deterministic parameter construction
# ---------------------------------------------------------------------------
def _head_rows(a_hd):
    """(H, D) attention vector -> (H, H*D) per-head row matrix (zeros off-block)."""
    num_heads, d = a_hd.shape
    m = jnp.zeros((num_heads, num_heads * d), jnp.float32)
    for h in range(num_heads):
        m = m.at[h, h * d:(h + 1) * d].set(a_hd[h])
    return m


def init_params(key, in_dim, out_dim, num_heads):
    keys = jax.random.split(key, len(_RELATIONS) + 4)
    w, b = {}, {}
    for i, (rel, src, dst) in enumerate(_RELATIONS):
        dout = out_dim[dst] * num_heads
        kw, kb = jax.random.split(keys[i])
        # stored pre-transposed: (in_dim, out_features), head-major columns
        w[rel] = 0.1 * jax.random.normal(kw, (in_dim[src], dout), jnp.float32)
        b[rel] = 0.1 * jax.random.normal(kb, (1, dout), jnp.float32)

    ds = out_dim['state']
    attn = {}
    for j, name in enumerate(('c_in_src', 'c_in_dst', 'p_in_src', 'p_in_dst')):
        # reference shape (1, num_heads, out_dim['state']) -> per-head rows (H, H*D)
        a = 0.1 * jax.random.normal(keys[len(_RELATIONS) + j],
                                    (num_heads, ds), jnp.float32)
        attn[name] = _head_rows(a)
    return {'w': w, 'b': b, 'attn': attn}


# ---------------------------------------------------------------------------
# Pure-JAX f32 reference (matches the torch/DGL forward) for validation
# ---------------------------------------------------------------------------
def reference_forward(params, feats, adjT, num_heads, out_dim, merge='cat'):
    use_relu = (merge == 'cat')
    adj = {e: a.astype(jnp.float32) for e, a in adjT.items()}
    wh = {rel: feats[src] @ params['w'][rel] + params['b'][rel]
          for rel, src, _ in _RELATIONS}

    def gat(wh_src, wh_dst, a_src_rows, a_dst_rows, adjm, d):
        attn_s = wh_src @ a_src_rows.T                       # (Ns, H)
        attn_d = wh_dst @ a_dst_rows.T                       # (Nd, H)
        outs = []
        for h in range(num_heads):
            e = attn_d[:, h:h + 1] + attn_s[:, h][None, :]   # (Nd, Ns)
            e = jnp.where(e > 0, e, 0.2 * e)
            e = jnp.where(adjm > 0, e, -jnp.inf)
            m = jnp.max(e, axis=-1, keepdims=True)
            m = jnp.where(jnp.isfinite(m), m, 0.0)
            p = jnp.where(adjm > 0, jnp.exp(e - m), 0.0)
            den = jnp.sum(p, axis=-1, keepdims=True)
            den = jnp.where(den == 0.0, 1.0, den)
            outs.append((p / den) @ wh_src[:, h * d:(h + 1) * d])
        return jnp.concatenate(outs, axis=-1)

    ds = out_dim['state']
    ft_c = gat(wh['c_in'], wh['s_in'], params['attn']['c_in_src'],
               params['attn']['c_in_dst'], adj['c_in'], ds)
    ft_p = gat(wh['p_in'], wh['s_in'], params['attn']['p_in_src'],
               params['attn']['p_in_dst'], adj['p_in'], ds)

    h = {
        'crew': wh['crew'] + adj['repaired_by'] @ wh['repaired_by'],
        'plane': wh['plane'] + adj['repairing'] @ wh['repairing'],
        'state': wh['s_in'] + ft_c + ft_p,
        'value': wh['v_to'] + adj['p_to'] @ wh['p_to'] + adj['s_to'] @ wh['s_to'],
    }
    if use_relu:
        h = {k: jnp.maximum(v, 0.0) for k, v in h.items()}
    if merge == 'cat':
        return h
    return {nt: jnp.mean(v.reshape(v.shape[0], num_heads, -1), axis=1)
            for nt, v in h.items()}


if __name__ == "__main__":
    num_heads = 2
    in_dim = {'crew': 8, 'plane': 16, 'state': 8, 'value': 8}
    out_dim = {'crew': 8, 'plane': 8, 'state': 16, 'value': 8}
    n_nodes = {'crew': 16, 'plane': 12, 'state': 8, 'value': 4}

    key = jax.random.PRNGKey(0)
    kp, kf, ka = jax.random.split(key, 3)

    params = init_params(kp, in_dim, out_dim, num_heads)

    fkeys = jax.random.split(kf, len(_NTYPES))
    feats = {nt: jax.random.normal(fkeys[i], (n_nodes[nt], in_dim[nt]), jnp.float32)
             for i, nt in enumerate(_NTYPES)}

    # Adjacency masks stored dst-major and in bf16 (0/1 exact): adjT[etype] is
    # (N_dst, N_src).
    edge_src_dst = {
        'c_in': ('crew', 'state'), 'repairing': ('crew', 'plane'),
        'p_in': ('plane', 'state'), 'p_to': ('plane', 'value'),
        'repaired_by': ('plane', 'crew'), 's_in': ('state', 'state'),
        's_to': ('state', 'value'), 'v_to': ('value', 'value'),
    }
    akeys = jax.random.split(ka, len(edge_src_dst))
    adjT = {}
    for i, (et, (s, d)) in enumerate(edge_src_dst.items()):
        adjT[et] = jax.random.bernoulli(
            akeys[i], 0.5, (n_nodes[d], n_nodes[s])).astype(jnp.bfloat16)

    out = multi_hetero_gat_forward(params, feats, adjT, num_heads, out_dim,
                                   merge='cat')
    for nt in _NTYPES:
        jax.block_until_ready(out[nt])
        assert out[nt].shape == (n_nodes[nt], num_heads * out_dim[nt])

    ref = reference_forward(params, feats, adjT, num_heads, out_dim, merge='cat')
    for nt in _NTYPES:
        assert jnp.allclose(out[nt], ref[nt], atol=5e-2, rtol=5e-2), (
            nt, float(jnp.max(jnp.abs(out[nt] - ref[nt]))))

    print("KERNEL_OK")
</pallas_src>

<mosaic_0001>
module attributes {stable_mosaic.version = 11 : i64} {
  func.func @_fused_kernel(%arg0: memref<16x8xbf16, #tpu.memory_space<vmem>>, %arg1: memref<12x16xbf16, #tpu.memory_space<vmem>>, %arg2: memref<8x8xbf16, #tpu.memory_space<vmem>>, %arg3: memref<4x8xbf16, #tpu.memory_space<vmem>>, %arg4: memref<8x16xbf16, #tpu.memory_space<vmem>>, %arg5: memref<1x16xf32, #tpu.memory_space<vmem>>, %arg6: memref<16x16xbf16, #tpu.memory_space<vmem>>, %arg7: memref<1x16xf32, #tpu.memory_space<vmem>>, %arg8: memref<8x32xbf16, #tpu.memory_space<vmem>>, %arg9: memref<1x32xf32, #tpu.memory_space<vmem>>, %arg10: memref<8x16xbf16, #tpu.memory_space<vmem>>, %arg11: memref<1x16xf32, #tpu.memory_space<vmem>>, %arg12: memref<16x32xbf16, #tpu.memory_space<vmem>>, %arg13: memref<1x32xf32, #tpu.memory_space<vmem>>, %arg14: memref<16x16xbf16, #tpu.memory_space<vmem>>, %arg15: memref<1x16xf32, #tpu.memory_space<vmem>>, %arg16: memref<16x16xbf16, #tpu.memory_space<vmem>>, %arg17: memref<1x16xf32, #tpu.memory_space<vmem>>, %arg18: memref<8x32xbf16, #tpu.memory_space<vmem>>, %arg19: memref<1x32xf32, #tpu.memory_space<vmem>>, %arg20: memref<8x16xbf16, #tpu.memory_space<vmem>>, %arg21: memref<1x16xf32, #tpu.memory_space<vmem>>, %arg22: memref<8x16xbf16, #tpu.memory_space<vmem>>, %arg23: memref<1x16xf32, #tpu.memory_space<vmem>>, %arg24: memref<2x32xf32, #tpu.memory_space<vmem>>, %arg25: memref<2x32xf32, #tpu.memory_space<vmem>>, %arg26: memref<2x32xf32, #tpu.memory_space<vmem>>, %arg27: memref<2x32xf32, #tpu.memory_space<vmem>>, %arg28: memref<8x16xbf16, #tpu.memory_space<vmem>>, %arg29: memref<8x12xbf16, #tpu.memory_space<vmem>>, %arg30: memref<16x12xbf16, #tpu.memory_space<vmem>>, %arg31: memref<12x16xbf16, #tpu.memory_space<vmem>>, %arg32: memref<4x12xbf16, #tpu.memory_space<vmem>>, %arg33: memref<4x8xbf16, #tpu.memory_space<vmem>>, %arg34: memref<16x16xf32, #tpu.memory_space<vmem>>, %arg35: memref<12x16xf32, #tpu.memory_space<vmem>>, %arg36: memref<8x32xf32, #tpu.memory_space<vmem>>, %arg37: memref<4x16xf32, #tpu.memory_space<vmem>>) attributes {dimension_semantics = [], scalar_prefetch = 0 : i64, scratch_operands = 0 : i64, tpu.core_type = #tpu.core_type<tc>} {
    %c0 = arith.constant 0 : index
    %c0_0 = arith.constant 0 : index
    %0 = vector.load %arg0[%c0, %c0_0] : memref<16x8xbf16, #tpu.memory_space<vmem>>, vector<16x8xbf16>
    %c0_1 = arith.constant 0 : index
    %c0_2 = arith.constant 0 : index
    %1 = vector.load %arg1[%c0_1, %c0_2] : memref<12x16xbf16, #tpu.memory_space<vmem>>, vector<12x16xbf16>
    %c0_3 = arith.constant 0 : index
    %c0_4 = arith.constant 0 : index
    %2 = vector.load %arg2[%c0_3, %c0_4] : memref<8x8xbf16, #tpu.memory_space<vmem>>, vector<8x8xbf16>
    %c0_5 = arith.constant 0 : index
    %c0_6 = arith.constant 0 : index
    %3 = vector.load %arg3[%c0_5, %c0_6] : memref<4x8xbf16, #tpu.memory_space<vmem>>, vector<4x8xbf16>
    %c0_7 = arith.constant 0 : index
    %c0_8 = arith.constant 0 : index
    %4 = vector.load %arg4[%c0_7, %c0_8] : memref<8x16xbf16, #tpu.memory_space<vmem>>, vector<8x16xbf16>
    %cst = arith.constant dense<0.000000e+00> : vector<16x16xf32>
    %5 = tpu.matmul %0, %4, %cst {dimension_numbers = #tpu.dot_dimension_numbers<[1], [0], [0], [1], [0, 0, 1, 1], [], []>} : vector<16x8xbf16>, vector<8x16xbf16>, vector<16x16xf32> -> vector<16x16xf32>
    %c0_9 = arith.constant 0 : index
    %c0_10 = arith.constant 0 : index
    %6 = vector.load %arg5[%c0_9, %c0_10] : memref<1x16xf32, #tpu.memory_space<vmem>>, vector<1x16xf32>
    %7 = vector.broadcast %6 : vector<1x16xf32> to vector<16x16xf32>
    %8 = arith.addf %5, %7 : vector<16x16xf32>
    %c0_11 = arith.constant 0 : index
    %c0_12 = arith.constant 0 : index
    %9 = vector.load %arg6[%c0_11, %c0_12] : memref<16x16xbf16, #tpu.memory_space<vmem>>, vector<16x16xbf16>
    %cst_13 = arith.constant dense<0.000000e+00> : vector<12x16xf32>
    %10 = tpu.matmul %1, %9, %cst_13 {dimension_numbers = #tpu.dot_dimension_numbers<[1], [0], [0], [1], [0, 0, 1, 1], [], []>} : vector<12x16xbf16>, vector<16x16xbf16>, vector<12x16xf32> -> vector<12x16xf32>
    %c0_14 = arith.constant 0 : index
    %c0_15 = arith.constant 0 : index
    %11 = vector.load %arg7[%c0_14, %c0_15] : memref<1x16xf32, #tpu.memory_space<vmem>>, vector<1x16xf32>
    %12 = vector.broadcast %11 : vector<1x16xf32> to vector<12x16xf32>
    %13 = arith.addf %10, %12 : vector<12x16xf32>
    %c0_16 = arith.constant 0 : index
    %c0_17 = arith.constant 0 : index
    %14 = vector.load %arg8[%c0_16, %c0_17] : memref<8x32xbf16, #tpu.memory_space<vmem>>, vector<8x32xbf16>
    %cst_18 = arith.constant dense<0.000000e+00> : vector<16x32xf32>
    %15 = tpu.matmul %0, %14, %cst_18 {dimension_numbers = #tpu.dot_dimension_numbers<[1], [0], [0], [1], [0, 0, 1, 1], [], []>} : vector<16x8xbf16>, vector<8x32xbf16>, vector<16x32xf32> -> vector<16x32xf32>
    %c0_19 = arith.constant 0 : index
    %c0_20 = arith.constant 0 : index
    %16 = vector.load %arg9[%c0_19, %c0_20] : memref<1x32xf32, #tpu.memory_space<vmem>>, vector<1x32xf32>
    %17 = vector.broadcast %16 : vector<1x32xf32> to vector<16x32xf32>
    %18 = arith.addf %15, %17 : vector<16x32xf32>
    %c0_21 = arith.constant 0 : index
    %c0_22 = arith.constant 0 : index
    %19 = vector.load %arg10[%c0_21, %c0_22] : memref<8x16xbf16, #tpu.memory_space<vmem>>, vector<8x16xbf16>
    %cst_23 = arith.constant dense<0.000000e+00> : vector<16x16xf32>
    %20 = tpu.matmul %0, %19, %cst_23 {dimension_numbers = #tpu.dot_dimension_numbers<[1], [0], [0], [1], [0, 0, 1, 1], [], []>} : vector<16x8xbf16>, vector<8x16xbf16>, vector<16x16xf32> -> vector<16x16xf32>
    %c0_24 = arith.constant 0 : index
    %c0_25 = arith.constant 0 : index
    %21 = vector.load %arg11[%c0_24, %c0_25] : memref<1x16xf32, #tpu.memory_space<vmem>>, vector<1x16xf32>
    %22 = vector.broadcast %21 : vector<1x16xf32> to vector<16x16xf32>
    %23 = arith.addf %20, %22 : vector<16x16xf32>
    %c0_26 = arith.constant 0 : index
    %c0_27 = arith.constant 0 : index
    %24 = vector.load %arg12[%c0_26, %c0_27] : memref<16x32xbf16, #tpu.memory_space<vmem>>, vector<16x32xbf16>
    %cst_28 = arith.constant dense<0.000000e+00> : vector<12x32xf32>
    %25 = tpu.matmul %1, %24, %cst_28 {dimension_numbers = #tpu.dot_dimension_numbers<[1], [0], [0], [1], [0, 0, 1, 1], [], []>} : vector<12x16xbf16>, vector<16x32xbf16>, vector<12x32xf32> -> vector<12x32xf32>
    %c0_29 = arith.constant 0 : index
    %c0_30 = arith.constant 0 : index
    %26 = vector.load %arg13[%c0_29, %c0_30] : memref<1x32xf32, #tpu.memory_space<vmem>>, vector<1x32xf32>
    %27 = vector.broadcast %26 : vector<1x32xf32> to vector<12x32xf32>
    %28 = arith.addf %25, %27 : vector<12x32xf32>
    %c0_31 = arith.constant 0 : index
    %c0_32 = arith.constant 0 : index
    %29 = vector.load %arg14[%c0_31, %c0_32] : memref<16x16xbf16, #tpu.memory_space<vmem>>, vector<16x16xbf16>
    %cst_33 = arith.constant dense<0.000000e+00> : vector<12x16xf32>
    %30 = tpu.matmul %1, %29, %cst_33 {dimension_numbers = #tpu.dot_dimension_numbers<[1], [0], [0], [1], [0, 0, 1, 1], [], []>} : vector<12x16xbf16>, vector<16x16xbf16>, vector<12x16xf32> -> vector<12x16xf32>
    %c0_34 = arith.constant 0 : index
    %c0_35 = arith.constant 0 : index
    %31 = vector.load %arg15[%c0_34, %c0_35] : memref<1x16xf32, #tpu.memory_space<vmem>>, vector<1x16xf32>
    %32 = vector.broadcast %31 : vector<1x16xf32> to vector<12x16xf32>
    %33 = arith.addf %30, %32 : vector<12x16xf32>
    %c0_36 = arith.constant 0 : index
    %c0_37 = arith.constant 0 : index
    %34 = vector.load %arg16[%c0_36, %c0_37] : memref<16x16xbf16, #tpu.memory_space<vmem>>, vector<16x16xbf16>
    %cst_38 = arith.constant dense<0.000000e+00> : vector<12x16xf32>
    %35 = tpu.matmul %1, %34, %cst_38 {dimension_numbers = #tpu.dot_dimension_numbers<[1], [0], [0], [1], [0, 0, 1, 1], [], []>} : vector<12x16xbf16>, vector<16x16xbf16>, vector<12x16xf32> -> vector<12x16xf32>
    %c0_39 = arith.constant 0 : index
    %c0_40 = arith.constant 0 : index
    %36 = vector.load %arg17[%c0_39, %c0_40] : memref<1x16xf32, #tpu.memory_space<vmem>>, vector<1x16xf32>
    %37 = vector.broadcast %36 : vector<1x16xf32> to vector<12x16xf32>
    %38 = arith.addf %35, %37 : vector<12x16xf32>
    %c0_41 = arith.constant 0 : index
    %c0_42 = arith.constant 0 : index
    %39 = vector.load %arg18[%c0_41, %c0_42] : memref<8x32xbf16, #tpu.memory_space<vmem>>, vector<8x32xbf16>
    %cst_43 = arith.constant dense<0.000000e+00> : vector<8x32xf32>
    %40 = tpu.matmul %2, %39, %cst_43 {dimension_numbers = #tpu.dot_dimension_numbers<[1], [0], [0], [1], [0, 0, 1, 1], [], []>} : vector<8x8xbf16>, vector<8x32xbf16>, vector<8x32xf32> -> vector<8x32xf32>
    %c0_44 = arith.constant 0 : index
    %c0_45 = arith.constant 0 : index
    %41 = vector.load %arg19[%c0_44, %c0_45] : memref<1x32xf32, #tpu.memory_space<vmem>>, vector<1x32xf32>
    %42 = vector.broadcast %41 : vector<1x32xf32> to vector<8x32xf32>
    %43 = arith.addf %40, %42 : vector<8x32xf32>
    %c0_46 = arith.constant 0 : index
    %c0_47 = arith.constant 0 : index
    %44 = vector.load %arg20[%c0_46, %c0_47] : memref<8x16xbf16, #tpu.memory_space<vmem>>, vector<8x16xbf16>
    %cst_48 = arith.constant dense<0.000000e+00> : vector<8x16xf32>
    %45 = tpu.matmul %2, %44, %cst_48 {dimension_numbers = #tpu.dot_dimension_numbers<[1], [0], [0], [1], [0, 0, 1, 1], [], []>} : vector<8x8xbf16>, vector<8x16xbf16>, vector<8x16xf32> -> vector<8x16xf32>
    %c0_49 = arith.constant 0 : index
    %c0_50 = arith.constant 0 : index
    %46 = vector.load %arg21[%c0_49, %c0_50] : memref<1x16xf32, #tpu.memory_space<vmem>>, vector<1x16xf32>
    %47 = vector.broadcast %46 : vector<1x16xf32> to vector<8x16xf32>
    %48 = arith.addf %45, %47 : vector<8x16xf32>
    %c0_51 = arith.constant 0 : index
    %c0_52 = arith.constant 0 : index
    %49 = vector.load %arg22[%c0_51, %c0_52] : memref<8x16xbf16, #tpu.memory_space<vmem>>, vector<8x16xbf16>
    %cst_53 = arith.constant dense<0.000000e+00> : vector<4x16xf32>
    %50 = tpu.matmul %3, %49, %cst_53 {dimension_numbers = #tpu.dot_dimension_numbers<[1], [0], [0], [1], [0, 0, 1, 1], [], []>} : vector<4x8xbf16>, vector<8x16xbf16>, vector<4x16xf32> -> vector<4x16xf32>
    %c0_54 = arith.constant 0 : index
    %c0_55 = arith.constant 0 : index
    %51 = vector.load %arg23[%c0_54, %c0_55] : memref<1x16xf32, #tpu.memory_space<vmem>>, vector<1x16xf32>
    %52 = vector.broadcast %51 : vector<1x16xf32> to vector<4x16xf32>
    %53 = arith.addf %50, %52 : vector<4x16xf32>
    %c0_56 = arith.constant 0 : index
    %c0_57 = arith.constant 0 : index
    %54 = vector.load %arg30[%c0_56, %c0_57] : memref<16x12xbf16, #tpu.memory_space<vmem>>, vector<16x12xbf16>
    %55 = arith.truncf %38 : vector<12x16xf32> to vector<12x16xbf16>
    %cst_58 = arith.constant dense<0.000000e+00> : vector<16x16xf32>
    %56 = tpu.matmul %54, %55, %cst_58 {dimension_numbers = #tpu.dot_dimension_numbers<[1], [0], [0], [1], [0, 0, 1, 1], [], []>} : vector<16x12xbf16>, vector<12x16xbf16>, vector<16x16xf32> -> vector<16x16xf32>
    %57 = arith.addf %8, %56 : vector<16x16xf32>
    %cst_59 = arith.constant 0.000000e+00 : f32
    %58 = vector.broadcast %cst_59 : f32 to vector<16x16xf32>
    %59 = arith.maximumf %57, %58 : vector<16x16xf32>
    %c0_60 = arith.constant 0 : index
    %c0_61 = arith.constant 0 : index
    %60 = vector.load %arg34[%c0_60, %c0_61] : memref<16x16xf32, #tpu.memory_space<vmem>>, vector<16x16xf32>
    tpu.vector_store %arg34[%c0_60, %c0_61], %59 {strides = array<i32>} : memref<16x16xf32, #tpu.memory_space<vmem>>, vector<16x16xf32>,
    %c0_62 = arith.constant 0 : index
    %c0_63 = arith.constant 0 : index
    %61 = vector.load %arg31[%c0_62, %c0_63] : memref<12x16xbf16, #tpu.memory_space<vmem>>, vector<12x16xbf16>
    %62 = arith.truncf %23 : vector<16x16xf32> to vector<16x16xbf16>
    %cst_64 = arith.constant dense<0.000000e+00> : vector<12x16xf32>
    %63 = tpu.matmul %61, %62, %cst_64 {dimension_numbers = #tpu.dot_dimension_numbers<[1], [0], [0], [1], [0, 0, 1, 1], [], []>} : vector<12x16xbf16>, vector<16x16xbf16>, vector<12x16xf32> -> vector<12x16xf32>
    %64 = arith.addf %13, %63 : vector<12x16xf32>
    %cst_65 = arith.constant 0.000000e+00 : f32
    %65 = vector.broadcast %cst_65 : f32 to vector<12x16xf32>
    %66 = arith.maximumf %64, %65 : vector<12x16xf32>
    %c0_66 = arith.constant 0 : index
    %c0_67 = arith.constant 0 : index
    %67 = vector.load %arg35[%c0_66, %c0_67] : memref<12x16xf32, #tpu.memory_space<vmem>>, vector<12x16xf32>
    tpu.vector_store %arg35[%c0_66, %c0_67], %66 {strides = array<i32>} : memref<12x16xf32, #tpu.memory_space<vmem>>, vector<12x16xf32>,
    %c0_68 = arith.constant 0 : index
    %c0_69 = arith.constant 0 : index
    %68 = vector.load %arg32[%c0_68, %c0_69] : memref<4x12xbf16, #tpu.memory_space<vmem>>, vector<4x12xbf16>
    %69 = arith.truncf %33 : vector<12x16xf32> to vector<12x16xbf16>
    %cst_70 = arith.constant dense<0.000000e+00> : vector<4x16xf32>
    %70 = tpu.matmul %68, %69, %cst_70 {dimension_numbers = #tpu.dot_dimension_numbers<[1], [0], [0], [1], [0, 0, 1, 1], [], []>} : vector<4x12xbf16>, vector<12x16xbf16>, vector<4x16xf32> -> vector<4x16xf32>
    %71 = arith.addf %53, %70 : vector<4x16xf32>
    %c0_71 = arith.constant 0 : index
    %c0_72 = arith.constant 0 : index
    %72 = vector.load %arg33[%c0_71, %c0_72] : memref<4x8xbf16, #tpu.memory_space<vmem>>, vector<4x8xbf16>
    %73 = arith.truncf %48 : vector<8x16xf32> to vector<8x16xbf16>
    %cst_73 = arith.constant dense<0.000000e+00> : vector<4x16xf32>
    %74 = tpu.matmul %72, %73, %cst_73 {dimension_numbers = #tpu.dot_dimension_numbers<[1], [0], [0], [1], [0, 0, 1, 1], [], []>} : vector<4x8xbf16>, vector<8x16xbf16>, vector<4x16xf32> -> vector<4x16xf32>
    %75 = arith.addf %71, %74 : vector<4x16xf32>
    %cst_74 = arith.constant 0.000000e+00 : f32
    %76 = vector.broadcast %cst_74 : f32 to vector<4x16xf32>
    %77 = arith.maximumf %75, %76 : vector<4x16xf32>
    %c0_75 = arith.constant 0 : index
    %c0_76 = arith.constant 0 : index
    %78 = vector.load %arg37[%c0_75, %c0_76] : memref<4x16xf32, #tpu.memory_space<vmem>>, vector<4x16xf32>
    tpu.vector_store %arg37[%c0_75, %c0_76], %77 {strides = array<i32>} : memref<4x16xf32, #tpu.memory_space<vmem>>, vector<4x16xf32>,
    %c0_77 = arith.constant 0 : index
    %c0_78 = arith.constant 0 : index
    %79 = vector.load %arg28[%c0_77, %c0_78] : memref<8x16xbf16, #tpu.memory_space<vmem>>, vector<8x16xbf16>
    %80 = arith.extf %79 : vector<8x16xbf16> to vector<8x16xf32>
    %c0_79 = arith.constant 0 : index
    %c0_80 = arith.constant 0 : index
    %81 = vector.load %arg29[%c0_79, %c0_80] : memref<8x12xbf16, #tpu.memory_space<vmem>>, vector<8x12xbf16>
    %82 = arith.extf %81 : vector<8x12xbf16> to vector<8x12xf32>
    %cst_81 = arith.constant 1.000000e+00 : f32
    %83 = vector.broadcast %cst_81 : f32 to vector<8x16xf32>
    %84 = arith.subf %80, %83 : vector<8x16xf32>
    %cst_82 = arith.constant 1.000000e+30 : f32
    %85 = vector.broadcast %cst_82 : f32 to vector<8x16xf32>
    %86 = arith.mulf %84, %85 : vector<8x16xf32>
    %cst_83 = arith.constant 1.000000e+00 : f32
    %87 = vector.broadcast %cst_83 : f32 to vector<8x12xf32>
    %88 = arith.subf %82, %87 : vector<8x12xf32>
    %cst_84 = arith.constant 1.000000e+30 : f32
    %89 = vector.broadcast %cst_84 : f32 to vector<8x12xf32>
    %90 = arith.mulf %88, %89 : vector<8x12xf32>
    %c0_85 = arith.constant 0 : index
    %c0_86 = arith.constant 0 : index
    %91 = vector.load %arg24[%c0_85, %c0_86] : memref<2x32xf32, #tpu.memory_space<vmem>>, vector<2x32xf32>
    %cst_87 = arith.constant dense<0.000000e+00> : vector<2x16xf32>
    %92 = tpu.matmul %91, %18, %cst_87 {dimension_numbers = #tpu.dot_dimension_numbers<[1], [1], [0], [0], [0, 0, 1, 0], [], []>} : vector<2x32xf32>, vector<16x32xf32>, vector<2x16xf32> -> vector<2x16xf32>
    %c0_88 = arith.constant 0 : index
    %c0_89 = arith.constant 0 : index
    %93 = vector.load %arg26[%c0_88, %c0_89] : memref<2x32xf32, #tpu.memory_space<vmem>>, vector<2x32xf32>
    %cst_90 = arith.constant dense<0.000000e+00> : vector<2x12xf32>
    %94 = tpu.matmul %93, %28, %cst_90 {dimension_numbers = #tpu.dot_dimension_numbers<[1], [1], [0], [0], [0, 0, 1, 0], [], []>} : vector<2x32xf32>, vector<12x32xf32>, vector<2x12xf32> -> vector<2x12xf32>
    %c0_91 = arith.constant 0 : index
    %c0_92 = arith.constant 0 : index
    %95 = vector.load %arg25[%c0_91, %c0_92] : memref<2x32xf32, #tpu.memory_space<vmem>>, vector<2x32xf32>
    %cst_93 = arith.constant dense<0.000000e+00> : vector<8x2xf32>
    %96 = tpu.matmul %43, %95, %cst_93 {dimension_numbers = #tpu.dot_dimension_numbers<[1], [1], [0], [0], [0, 0, 1, 0], [], []>} : vector<8x32xf32>, vector<2x32xf32>, vector<8x2xf32> -> vector<8x2xf32>
    %c0_94 = arith.constant 0 : index
    %c0_95 = arith.constant 0 : index
    %97 = vector.load %arg27[%c0_94, %c0_95] : memref<2x32xf32, #tpu.memory_space<vmem>>, vector<2x32xf32>
    %cst_96 = arith.constant dense<0.000000e+00> : vector<8x2xf32>
    %98 = tpu.matmul %43, %97, %cst_96 {dimension_numbers = #tpu.dot_dimension_numbers<[1], [1], [0], [0], [0, 0, 1, 0], [], []>} : vector<8x32xf32>, vector<2x32xf32>, vector<8x2xf32> -> vector<8x2xf32>
    %99 = arith.truncf %18 : vector<16x32xf32> to vector<16x32xbf16>
    %100 = arith.truncf %28 : vector<12x32xf32> to vector<12x32xbf16>
    %101 = vector.extract_strided_slice %96 {offsets = [0, 0], sizes = [8, 1], strides = [1, 1]} : vector<8x2xf32> to vector<8x1xf32>
    %102 = vector.extract_strided_slice %92 {offsets = [0, 0], sizes = [1, 16], strides = [1, 1]} : vector<2x16xf32> to vector<1x16xf32>
    %103 = vector.broadcast %101 : vector<8x1xf32> to vector<8x16xf32>
    %104 = vector.broadcast %102 : vector<1x16xf32> to vector<8x16xf32>
    %105 = arith.addf %103, %104 : vector<8x16xf32>
    %cst_97 = arith.constant 0.000000e+00 : f32
    %106 = vector.broadcast %cst_97 : f32 to vector<8x16xf32>
    %107 = arith.cmpf ogt, %105, %106 : vector<8x16xf32>
    %cst_98 = arith.constant 2.000000e-01 : f32
    %108 = vector.broadcast %cst_98 : f32 to vector<8x16xf32>
    %109 = arith.mulf %108, %105 : vector<8x16xf32>
    %110 = arith.select %107, %105, %109 : vector<8x16xi1>, vector<8x16xf32>
    %111 = arith.addf %110, %86 : vector<8x16xf32>
    %cst_99 = arith.constant dense<0xFF800000> : vector<8xf32>
    %112 = vector.multi_reduction <maximumf>, %111, %cst_99 [1] : vector<8x16xf32> to vector<8xf32>
    %113 = vector.shape_cast %112 : vector<8xf32> to vector<8x1xf32>
    %114 = vector.broadcast %113 : vector<8x1xf32> to vector<8x16xf32>
    %115 = arith.subf %111, %114 : vector<8x16xf32>
    %116 = math.exp %115 : vector<8x16xf32>
    %117 = arith.mulf %116, %80 : vector<8x16xf32>
    %cst_100 = arith.constant dense<0.000000e+00> : vector<8xf32>
    %118 = vector.multi_reduction <add>, %117, %cst_100 [1] : vector<8x16xf32> to vector<8xf32>
    %119 = vector.shape_cast %118 : vector<8xf32> to vector<8x1xf32>
    %cst_101 = arith.constant 0.000000e+00 : f32
    %120 = vector.broadcast %cst_101 : f32 to vector<8x1xf32>
    %121 = arith.cmpf oeq, %119, %120 : vector<8x1xf32>
    %cst_102 = arith.constant 1.000000e+00 : f32
    %122 = vector.broadcast %cst_102 : f32 to vector<8x1xf32>
    %123 = arith.select %121, %122, %119 : vector<8x1xi1>, vector<8x1xf32>
    %cst_103 = arith.constant 1.000000e+00 : f32
    %124 = vector.broadcast %cst_103 : f32 to vector<8x1xf32>
    %125 = arith.divf %124, %123 : vector<8x1xf32>
    %126 = vector.broadcast %125 : vector<8x1xf32> to vector<8x16xf32>
    %127 = arith.mulf %117, %126 : vector<8x16xf32>
    %128 = vector.extract_strided_slice %98 {offsets = [0, 0], sizes = [8, 1], strides = [1, 1]} : vector<8x2xf32> to vector<8x1xf32>
    %129 = vector.extract_strided_slice %94 {offsets = [0, 0], sizes = [1, 12], strides = [1, 1]} : vector<2x12xf32> to vector<1x12xf32>
    %130 = vector.broadcast %128 : vector<8x1xf32> to vector<8x12xf32>
    %131 = vector.broadcast %129 : vector<1x12xf32> to vector<8x12xf32>
    %132 = arith.addf %130, %131 : vector<8x12xf32>
    %cst_104 = arith.constant 0.000000e+00 : f32
    %133 = vector.broadcast %cst_104 : f32 to vector<8x12xf32>
    %134 = arith.cmpf ogt, %132, %133 : vector<8x12xf32>
    %cst_105 = arith.constant 2.000000e-01 : f32
    %135 = vector.broadcast %cst_105 : f32 to vector<8x12xf32>
    %136 = arith.mulf %135, %132 : vector<8x12xf32>
    %137 = arith.select %134, %132, %136 : vector<8x12xi1>, vector<8x12xf32>
    %138 = arith.addf %137, %90 : vector<8x12xf32>
    %cst_106 = arith.constant dense<0xFF800000> : vector<8xf32>
    %139 = vector.multi_reduction <maximumf>, %138, %cst_106 [1] : vector<8x12xf32> to vector<8xf32>
    %140 = vector.shape_cast %139 : vector<8xf32> to vector<8x1xf32>
    %141 = vector.broadcast %140 : vector<8x1xf32> to vector<8x12xf32>
    %142 = arith.subf %138, %141 : vector<8x12xf32>
    %143 = math.exp %142 : vector<8x12xf32>
    %144 = arith.mulf %143, %82 : vector<8x12xf32>
    %cst_107 = arith.constant dense<0.000000e+00> : vector<8xf32>
    %145 = vector.multi_reduction <add>, %144, %cst_107 [1] : vector<8x12xf32> to vector<8xf32>
    %146 = vector.shape_cast %145 : vector<8xf32> to vector<8x1xf32>
    %cst_108 = arith.constant 0.000000e+00 : f32
    %147 = vector.broadcast %cst_108 : f32 to vector<8x1xf32>
    %148 = arith.cmpf oeq, %146, %147 : vector<8x1xf32>
    %cst_109 = arith.constant 1.000000e+00 : f32
    %149 = vector.broadcast %cst_109 : f32 to vector<8x1xf32>
    %150 = arith.select %148, %149, %146 : vector<8x1xi1>, vector<8x1xf32>
    %cst_110 = arith.constant 1.000000e+00 : f32
    %151 = vector.broadcast %cst_110 : f32 to vector<8x1xf32>
    %152 = arith.divf %151, %150 : vector<8x1xf32>
    %153 = vector.broadcast %152 : vector<8x1xf32> to vector<8x12xf32>
    %154 = arith.mulf %144, %153 : vector<8x12xf32>
    %155 = vector.extract_strided_slice %43 {offsets = [0, 0], sizes = [8, 16], strides = [1, 1]} : vector<8x32xf32> to vector<8x16xf32>
    %156 = arith.truncf %127 : vector<8x16xf32> to vector<8x16xbf16>
    %157 = vector.extract_strided_slice %99 {offsets = [0, 0], sizes = [16, 16], strides = [1, 1]} : vector<16x32xbf16> to vector<16x16xbf16>
    %cst_111 = arith.constant dense<0.000000e+00> : vector<8x16xf32>
    %158 = tpu.matmul %156, %157, %cst_111 {dimension_numbers = #tpu.dot_dimension_numbers<[1], [0], [0], [1], [0, 0, 1, 1], [], []>} : vector<8x16xbf16>, vector<16x16xbf16>, vector<8x16xf32> -> vector<8x16xf32>
    %159 = arith.addf %155, %158 : vector<8x16xf32>
    %160 = arith.truncf %154 : vector<8x12xf32> to vector<8x12xbf16>
    %161 = vector.extract_strided_slice %100 {offsets = [0, 0], sizes = [12, 16], strides = [1, 1]} : vector<12x32xbf16> to vector<12x16xbf16>
    %cst_112 = arith.constant dense<0.000000e+00> : vector<8x16xf32>
    %162 = tpu.matmul %160, %161, %cst_112 {dimension_numbers = #tpu.dot_dimension_numbers<[1], [0], [0], [1], [0, 0, 1, 1], [], []>} : vector<8x12xbf16>, vector<12x16xbf16>, vector<8x16xf32> -> vector<8x16xf32>
    %163 = arith.addf %159, %162 : vector<8x16xf32>
    %cst_113 = arith.constant 0.000000e+00 : f32
    %164 = vector.broadcast %cst_113 : f32 to vector<8x16xf32>
    %165 = arith.maximumf %163, %164 : vector<8x16xf32>
    %c0_114 = arith.constant 0 : index
    %c0_115 = arith.constant 0 : index
    %166 = vector.load %arg36[%c0_114, %c0_115] : memref<8x32xf32, #tpu.memory_space<vmem>>, vector<8x16xf32>
    tpu.vector_store %arg36[%c0_114, %c0_115], %165 {strides = array<i32>} : memref<8x32xf32, #tpu.memory_space<vmem>>, vector<8x16xf32>,
    %167 = vector.extract_strided_slice %96 {offsets = [0, 1], sizes = [8, 1], strides = [1, 1]} : vector<8x2xf32> to vector<8x1xf32>
    %168 = vector.extract_strided_slice %92 {offsets = [1, 0], sizes = [1, 16], strides = [1, 1]} : vector<2x16xf32> to vector<1x16xf32>
    %169 = vector.broadcast %167 : vector<8x1xf32> to vector<8x16xf32>
    %170 = vector.broadcast %168 : vector<1x16xf32> to vector<8x16xf32>
    %171 = arith.addf %169, %170 : vector<8x16xf32>
    %cst_116 = arith.constant 0.000000e+00 : f32
    %172 = vector.broadcast %cst_116 : f32 to vector<8x16xf32>
    %173 = arith.cmpf ogt, %171, %172 : vector<8x16xf32>
    %cst_117 = arith.constant 2.000000e-01 : f32
    %174 = vector.broadcast %cst_117 : f32 to vector<8x16xf32>
    %175 = arith.mulf %174, %171 : vector<8x16xf32>
    %176 = arith.select %173, %171, %175 : vector<8x16xi1>, vector<8x16xf32>
    %177 = arith.addf %176, %86 : vector<8x16xf32>
    %cst_118 = arith.constant dense<0xFF800000> : vector<8xf32>
    %178 = vector.multi_reduction <maximumf>, %177, %cst_118 [1] : vector<8x16xf32> to vector<8xf32>
    %179 = vector.shape_cast %178 : vector<8xf32> to vector<8x1xf32>
    %180 = vector.broadcast %179 : vector<8x1xf32> to vector<8x16xf32>
    %181 = arith.subf %177, %180 : vector<8x16xf32>
    %182 = math.exp %181 : vector<8x16xf32>
    %183 = arith.mulf %182, %80 : vector<8x16xf32>
    %cst_119 = arith.constant dense<0.000000e+00> : vector<8xf32>
    %184 = vector.multi_reduction <add>, %183, %cst_119 [1] : vector<8x16xf32> to vector<8xf32>
    %185 = vector.shape_cast %184 : vector<8xf32> to vector<8x1xf32>
    %cst_120 = arith.constant 0.000000e+00 : f32
    %186 = vector.broadcast %cst_120 : f32 to vector<8x1xf32>
    %187 = arith.cmpf oeq, %185, %186 : vector<8x1xf32>
    %cst_121 = arith.constant 1.000000e+00 : f32
    %188 = vector.broadcast %cst_121 : f32 to vector<8x1xf32>
    %189 = arith.select %187, %188, %185 : vector<8x1xi1>, vector<8x1xf32>
    %cst_122 = arith.constant 1.000000e+00 : f32
    %190 = vector.broadcast %cst_122 : f32 to vector<8x1xf32>
    %191 = arith.divf %190, %189 : vector<8x1xf32>
    %192 = vector.broadcast %191 : vector<8x1xf32> to vector<8x16xf32>
    %193 = arith.mulf %183, %192 : vector<8x16xf32>
    %194 = vector.extract_strided_slice %98 {offsets = [0, 1], sizes = [8, 1], strides = [1, 1]} : vector<8x2xf32> to vector<8x1xf32>
    %195 = vector.extract_strided_slice %94 {offsets = [1, 0], sizes = [1, 12], strides = [1, 1]} : vector<2x12xf32> to vector<1x12xf32>
    %196 = vector.broadcast %194 : vector<8x1xf32> to vector<8x12xf32>
    %197 = vector.broadcast %195 : vector<1x12xf32> to vector<8x12xf32>
    %198 = arith.addf %196, %197 : vector<8x12xf32>
    %cst_123 = arith.constant 0.000000e+00 : f32
    %199 = vector.broadcast %cst_123 : f32 to vector<8x12xf32>
    %200 = arith.cmpf ogt, %198, %199 : vector<8x12xf32>
    %cst_124 = arith.constant 2.000000e-01 : f32
    %201 = vector.broadcast %cst_124 : f32 to vector<8x12xf32>
    %202 = arith.mulf %201, %198 : vector<8x12xf32>
    %203 = arith.select %200, %198, %202 : vector<8x12xi1>, vector<8x12xf32>
    %204 = arith.addf %203, %90 : vector<8x12xf32>
    %cst_125 = arith.constant dense<0xFF800000> : vector<8xf32>
    %205 = vector.multi_reduction <maximumf>, %204, %cst_125 [1] : vector<8x12xf32> to vector<8xf32>
    %206 = vector.shape_cast %205 : vector<8xf32> to vector<8x1xf32>
    %207 = vector.broadcast %206 : vector<8x1xf32> to vector<8x12xf32>
    %208 = arith.subf %204, %207 : vector<8x12xf32>
    %209 = math.exp %208 : vector<8x12xf32>
    %210 = arith.mulf %209, %82 : vector<8x12xf32>
    %cst_126 = arith.constant dense<0.000000e+00> : vector<8xf32>
    %211 = vector.multi_reduction <add>, %210, %cst_126 [1] : vector<8x12xf32> to vector<8xf32>
    %212 = vector.shape_cast %211 : vector<8xf32> to vector<8x1xf32>
    %cst_127 = arith.constant 0.000000e+00 : f32
    %213 = vector.broadcast %cst_127 : f32 to vector<8x1xf32>
    %214 = arith.cmpf oeq, %212, %213 : vector<8x1xf32>
    %cst_128 = arith.constant 1.000000e+00 : f32
    %215 = vector.broadcast %cst_128 : f32 to vector<8x1xf32>
    %216 = arith.select %214, %215, %212 : vector<8x1xi1>, vector<8x1xf32>
    %cst_129 = arith.constant 1.000000e+00 : f32
    %217 = vector.broadcast %cst_129 : f32 to vector<8x1xf32>
    %218 = arith.divf %217, %216 : vector<8x1xf32>
    %219 = vector.broadcast %218 : vector<8x1xf32> to vector<8x12xf32>
    %220 = arith.mulf %210, %219 : vector<8x12xf32>
    %221 = vector.extract_strided_slice %43 {offsets = [0, 16], sizes = [8, 16], strides = [1, 1]} : vector<8x32xf32> to vector<8x16xf32>
    %222 = arith.truncf %193 : vector<8x16xf32> to vector<8x16xbf16>
    %223 = vector.extract_strided_slice %99 {offsets = [0, 16], sizes = [16, 16], strides = [1, 1]} : vector<16x32xbf16> to vector<16x16xbf16>
    %cst_130 = arith.constant dense<0.000000e+00> : vector<8x16xf32>
    %224 = tpu.matmul %222, %223, %cst_130 {dimension_numbers = #tpu.dot_dimension_numbers<[1], [0], [0], [1], [0, 0, 1, 1], [], []>} : vector<8x16xbf16>, vector<16x16xbf16>, vector<8x16xf32> -> vector<8x16xf32>
    %225 = arith.addf %221, %224 : vector<8x16xf32>
    %226 = arith.truncf %220 : vector<8x12xf32> to vector<8x12xbf16>
    %227 = vector.extract_strided_slice %100 {offsets = [0, 16], sizes = [12, 16], strides = [1, 1]} : vector<12x32xbf16> to vector<12x16xbf16>
    %cst_131 = arith.constant dense<0.000000e+00> : vector<8x16xf32>
    %228 = tpu.matmul %226, %227, %cst_131 {dimension_numbers = #tpu.dot_dimension_numbers<[1], [0], [0], [1], [0, 0, 1, 1], [], []>} : vector<8x12xbf16>, vector<12x16xbf16>, vector<8x16xf32> -> vector<8x16xf32>
    %229 = arith.addf %225, %228 : vector<8x16xf32>
    %cst_132 = arith.constant 0.000000e+00 : f32
    %230 = vector.broadcast %cst_132 : f32 to vector<8x16xf32>
    %231 = arith.maximumf %229, %230 : vector<8x16xf32>
    %c0_133 = arith.constant 0 : index
    %c16 = arith.constant 16 : index
    %232 = vector.load %arg36[%c0_133, %c16] : memref<8x32xf32, #tpu.memory_space<vmem>>, vector<8x16xf32>
    tpu.vector_store %arg36[%c0_133, %c16], %231 {strides = array<i32>} : memref<8x32xf32, #tpu.memory_space<vmem>>, vector<8x16xf32>,
    return
  }
}

</mosaic_0001>

<bundles_post_ra>
// kernel: tpu_custom_call.1
= control target key start
LH: loop header
LB: loop body
LE: loop exit
PB: predicated region body
PF: predicated region fallthrough
CT: control target
= control target key end

     0   :  { %s2817_s6 = smov 1   ;;  %s2818_s10 = smov 2   ;;  %s3284_s0 = inlined_call_operand.smem [shape: u32[38], index: -1, kind: input, shape index: {}] }
   0x1   :  { %s2896_s5 = sld [smem:[%s3284_s0]]   ;;  %s2819_s14 = smov 3  }
   0x2   :  { %s2901_s9 = sld [smem:[%s3284_s0 + %s2817_s6]]   ;;  %s2820_s18 = smov 4  }
   0x3   :  { %s2906_s13 = sld [smem:[%s3284_s0 + %s2818_s10]]   ;;  %s2821_s22 = smov 5  }
   0x4   :  { %s2911_s17 = sld [smem:[%s3284_s0 + %s2819_s14]]   ;;  %s2822_s26 = smov 6  }
   0x5   :  { %s2916_s21 = sld [smem:[%s3284_s0 + %s2820_s18]]   ;;  %s2823_s30 = smov 7  }
   0x6   :  { %s2921_s25 = sld [smem:[%s3284_s0 + %s2821_s22]]   ;;  %s2824_s4 = smov 8  }
   0x7   :  { %3285 = sst [smem:[#allocation58_spill]] %s2896_s5  ;;  %s2825_s10 = smov 9  }
   0x8   :  { %3286 = sst [smem:[#allocation59_spill]] %s2901_s9  ;;  %s2826_s15 = smov 10  }
   0x9   :  { %s2926_s29 = sld [smem:[%s3284_s0 + %s2822_s26]]   ;;  %s2827_s20 = smov 11  }
   0xa   :  { %s2931_s3 = sld [smem:[%s3284_s0 + %s2823_s30]]   ;;  %s2828_s26 = smov 12  }
   0xb   :  { %s2936_s8 = sld [smem:[%s3284_s0 + %s2824_s4]]   ;;  %s2829_s1 = smov 13  }
   0xc   :  { %s2941_s14 = sld [smem:[%s3284_s0 + %s2825_s10]]   ;;  %s2830_s7 = smov 14  }
   0xd   :  { %s2946_s19 = sld [smem:[%s3284_s0 + %s2826_s15]]   ;;  %s2831_s15 = smov 15  }
   0xe   :  { %s2951_s24 = sld [smem:[%s3284_s0 + %s2827_s20]]   ;;  %s2832_s22 = smov 16  }
   0xf   :  { %3287 = sst [smem:[#allocation60_spill]] %s2926_s29  ;;  %s2833_s28 = smov 17  }
  0x10   :  { %s2956_s30 = sld [smem:[%s3284_s0 + %s2828_s26]]  }
  0x11   :  { %s2961_s6 = sld [smem:[%s3284_s0 + %s2829_s1]]  }
  0x12   :  { %s2966_s12 = sld [smem:[%s3284_s0 + %s2830_s7]]   ;;  %s2834_s7 = smov 18  }
  0x13   :  { %s2971_s20 = sld [smem:[%s3284_s0 + %s2831_s15]]   ;;  %s2835_s15 = smov 19  }
  0x14   :  { %3288 = sst [smem:[#allocation61_spill]] %s2951_s24 }
  0x15   :  { %s2976_s27 = sld [smem:[%s3284_s0 + %s2832_s22]]   ;;  %s2836_s22 = smov 20  }
  0x16   :  { %3289 = sst [smem:[#allocation62_spill]] %s2956_s30 }
  0x17   :  { %s2981_s4 = sld [smem:[%s3284_s0 + %s2833_s28]]   ;;  %s2837_s28 = smov 21  }
  0x18   :  { %3290 = sst [smem:[#allocation63_spill]] %s2966_s12 }
  0x19   :  { %3291 = sst [smem:[#allocation64_spill]] %s2971_s20 }
  0x1a   :  { %s2986_s12 = sld [smem:[%s3284_s0 + %s2834_s7]]   ;;  %s2838_s7 = smov 22  }
  0x1b   :  { %3292 = sst [smem:[#allocation65_spill]] %s2976_s27 }
  0x1c   :  { %s2991_s30 = sld [smem:[%s3284_s0 + %s2835_s15]]   ;;  %s2839_s15 = smov 23  }
  0x1d   :  { %s2996_s27 = sld [smem:[%s3284_s0 + %s2836_s22]]   ;;  %s2840_s22 = smov 24  }
  0x1e   :  { %s3001_s9 = sld [smem:[%s3284_s0 + %s2837_s28]]   ;;  %s2841_s28 = smov 25  }
  0x1f   :  { %s3006_s5 = sld [smem:[%s3284_s0 + %s2838_s7]]   ;;  %s2842_s7 = smov 26  }
  0x20   :  { %3293 = sst [smem:[#allocation66_spill]] %s2986_s12 }
  0x21   :  { %s3011_s29 = sld [smem:[%s3284_s0 + %s2839_s15]]   ;;  %s2843_s15 = smov 27  }
  0x22   :  { %s3021_s12 = sld [smem:[%s3284_s0 + %s2841_s28]]   ;;  %s2845_s28 = smov 29  }
  0x23   :  { %3294 = sst [smem:[#allocation67_spill]] %s2996_s27 }
  0x24   :  { %s3016_s27 = sld [smem:[%s3284_s0 + %s2840_s22]]   ;;  %s2844_s22 = smov 28  }
  0x25   :  { %3295 = sst [smem:[#allocation68_spill]] %s3006_s5 }
  0x26   :  { %s3026_s5 = sld [smem:[%s3284_s0 + %s2842_s7]]   ;;  %s2846_s7 = smov 30  }
  0x27   :  { %s3031_s20 = sld [smem:[%s3284_s0 + %s2843_s15]]   ;;  %s2847_s15 = smov 31  }
  0x28   :  { %s3041_s24 = sld [smem:[%s3284_s0 + %s2845_s28]]   ;;  %s2849_s28 = smov 33  }
  0x2a   :  { %3296 = sst [smem:[#allocation69_spill]] %s3016_s27 }
  0x2b   :  { %s3036_s27 = sld [smem:[%s3284_s0 + %s2844_s22]]   ;;  %s2848_s22 = smov 32  }
  0x2c   :  { %3297 = sst [smem:[#allocation70_spill]] %s3026_s5 }
  0x2d   :  { %3298 = sst [smem:[#allocation71_spill]] %s3031_s20 }
  0x2e   :  { %3300 = sst [smem:[#allocation73_spill]] %s3041_s24 }
  0x2f   :  { %s3046_s5 = sld [smem:[%s3284_s0 + %s2846_s7]]   ;;  %s2850_s7 = smov 34  }
  0x30   :  { %s3051_s20 = sld [smem:[%s3284_s0 + %s2847_s15]]   ;;  %s2851_s15 = smov 35  }
  0x31   :  { %3299 = sst [smem:[#allocation72_spill]] %s3036_s27 }
  0x32   :  { %s3056_s27 = sld [smem:[%s3284_s0 + %s2848_s22]]   ;;  %s2852_s22 = smov 36  }
  0x33   :  { %s3061_s24 = sld [smem:[%s3284_s0 + %s2849_s28]]   ;;  %s2853_s28 = smov 37  }
  0x35   :  { %3301 = sst [smem:[#allocation74_spill]] %s3046_s5 }
  0x36   :  { %3302 = sst [smem:[#allocation75_spill]] %s3051_s20 }
  0x37   :  { %s3066_s5 = sld [smem:[%s3284_s0 + %s2850_s7]]  }
  0x38   :  { %3303 = sst [smem:[#allocation76_spill]] %s3056_s27 }
  0x39   :  { %3304 = sst [smem:[#allocation77_spill]] %s3061_s24 }
  0x3a   :  { %s3071_s20 = sld [smem:[%s3284_s0 + %s2851_s15]]  }
  0x3b   :  { %s3076_s27 = sld [smem:[%s3284_s0 + %s2852_s22]]  }
  0x3c   :  { %s3081_s24 = sld [smem:[%s3284_s0 + %s2853_s28]]  }
  0x3d   :  { %81 = vsyncpa [#allocation3], 0 }
  0x3e   :  { %82 = vsyncpa [#allocation6], 0 }
  0x3f   :  { %83 = vsyncpa [#allocation9], 0 }
  0x40   :  { %84 = vsyncpa [#allocation12], 0 }
  0x41   :  { %85 = vsyncpa [#allocation15], 0 }
  0x42   :  { %86 = vsyncpa [#allocation18], 0 }
  0x43   :  { %87 = vsyncpa [#allocation21], 0 }
  0x44   :  { %88 = vsyncpa [#allocation24], 0 }
  0x45   :  { %89 = vsyncpa [#allocation27], 0 }
  0x46   :  { %90 = vsyncpa [#allocation30], 0 }
  0x47   :  { %91 = vsyncpa [#allocation33], 0 }
  0x48   :  { %92 = vsyncpa [#allocation36], 0 }
  0x49   :  { %93 = vsyncpa [#allocation4], 0 }
  0x4a   :  { %94 = vsyncpa [#allocation39], 0 }
  0x4b   :  { %95 = vsyncpa [#allocation42], 0  ;;  %s2854_s7 = smov [#allocation5]   ;;  %s2855_s11 = smov [#allocation8]  }
  0x4c   :  { %s116_s10 = sshll.u32 %s2854_s7, 4  ;;  %s136_s0 = sshll.u32 %s2855_s11, 4  ;;  %s117_s10 = int_to_ptr.vmem [resolvable:$true] %s116_s10  ;;  %s137_s0 = int_to_ptr.vmem [resolvable:$true] %s136_s0 }
  0x4d   :  { %s2275_s15 = scalar_lea.vmem %s117_s10, 32  ;;  %p2280_p1 = scmp.lt.s32.totalorder %s117_s10, %s117_s10 }
  0x4e   :  { %p2276_p0 = scmp.ne.s32.totalorder %s117_s10, %s2275_s15  ;;  %p2281_p2 = scmp.lt.s32.totalorder %s2275_s15, %s2275_s15 }
  0x50   :  { %p2282_p3 = por %p2281_p2, %p2280_p1 }
  0x52   :  { %p2283_p4 = pnand %p2282_p3, %p2276_p0 }
  0x54   :  { %2286 = shalt.err (!%p2283_p4)
}
  0x55   :  { %119 = dma.hbm_to_vmem [thread:$0]  %s2911_s17, 32, %s117_s10, [#allocation6]  }
  0x56   :  { %s2295_s16 = scalar_lea.vmem %s137_s0, 16  ;;  %s2299_s18 = scalar_lea.vmem %s137_s0, 32 }
  0x57   :  { %p2296_p5 = scmp.ne.s32.totalorder %s137_s0, %s2295_s16  ;;  %p2300_p6 = scmp.lt.s32.totalorder %s137_s0, %s137_s0 }
  0x58   :  { %p2301_p7 = scmp.lt.s32.totalorder %s2299_s18, %s2295_s16 }
  0x5a   :  { %p2302_p8 = por %p2301_p7, %p2300_p6 }
  0x5c   :  { %p2303_p9 = pnand %p2302_p8, %p2296_p5 }
  0x5e   :  { %2306 = shalt.err (!%p2303_p9)
}
  0x5f   :  { %139 = dma.hbm_to_vmem [thread:$0]  %s2921_s25, 16, %s137_s0, [#allocation9]  }
  0x60   :  { %s2856_s22 = smov [#allocation11]   ;;  %s2857_s26 = smov [#allocation14]  }
  0x61   :  { %s158_s23 = sshll.u32 %s2856_s22, 4  ;;  %s178_s28 = sshll.u32 %s2857_s26, 4  ;;  %s159_s23 = int_to_ptr.vmem [resolvable:$true] %s158_s23  ;;  %s179_s28 = int_to_ptr.vmem [resolvable:$true] %s178_s28 }
  0x62   :  { %s2315_s1 = scalar_lea.vmem %s159_s23, 64  ;;  %p2320_p11 = scmp.lt.s32.totalorder %s159_s23, %s159_s23 }
  0x63   :  { %p2316_p10 = scmp.ne.s32.totalorder %s159_s23, %s2315_s1  ;;  %p2321_p12 = scmp.lt.s32.totalorder %s2315_s1, %s2315_s1 }
  0x65   :  { %p2322_p13 = por %p2321_p12, %p2320_p11 }
  0x67   :  { %p2323_p0 = pnand %p2322_p13, %p2316_p10 }
  0x69   :  { %2326 = shalt.err (!%p2323_p0)
}
  0x6a   :  { %161 = dma.hbm_to_vmem [thread:$0]  %s2936_s8, 64, %s159_s23, [#allocation12]  }
  0x6b   :  { %s2335_s17 = scalar_lea.vmem %s179_s28, 64  ;;  %p2340_p2 = scmp.lt.s32.totalorder %s179_s28, %s179_s28 }
  0x6c   :  { %p2336_p1 = scmp.ne.s32.totalorder %s179_s28, %s2335_s17  ;;  %p2341_p3 = scmp.lt.s32.totalorder %s2335_s17, %s2335_s17 }
  0x6e   :  { %p2342_p4 = por %p2341_p3, %p2340_p2 }
  0x70   :  { %p2343_p5 = pnand %p2342_p4, %p2336_p1 }
  0x72   :  { %2346 = shalt.err (!%p2343_p5)
}
  0x73   :  { %181 = dma.hbm_to_vmem [thread:$0]  %s2946_s19, 64, %s179_s28, [#allocation15]  }
  0x74   :  { %s2858_s25 = smov [#allocation17]   ;;  %s2859_s7 = smov [#allocation20]  }
  0x75   :  { %s200_s2 = sshll.u32 %s2858_s25, 4  ;;  %s224_s10 = sshll.u32 %s2859_s7, 4  ;;  %s201_s2 = int_to_ptr.vmem [resolvable:$true] %s200_s2  ;;  %s225_s10 = int_to_ptr.vmem [resolvable:$true] %s224_s10 }
  0x76   :  { %s2355_s11 = scalar_lea.vmem %s201_s2, 16  ;;  %s2359_s0 = scalar_lea.vmem %s201_s2, 32 }
  0x77   :  { %p2356_p6 = scmp.ne.s32.totalorder %s201_s2, %s2355_s11  ;;  %p2360_p7 = scmp.lt.s32.totalorder %s201_s2, %s201_s2 }
  0x78   :  { %p2361_p8 = scmp.lt.s32.totalorder %s2359_s0, %s2355_s11 }
  0x7a   :  { %p2362_p9 = por %p2361_p8, %p2360_p7 }
  0x7c   :  { %p2363_p10 = pnand %p2362_p9, %p2356_p6 }
  0x7e   :  { %2366 = shalt.err (!%p2363_p10)
}
  0x7f   :  { %203 = dma.hbm_to_vmem [thread:$0]  %s2961_s6, 16, %s201_s2, [#allocation18]  }
  0x80   :  { %s2375_s8 = scalar_lea.vmem %s225_s10, 16  ;;  %s2379_s15 = scalar_lea.vmem %s225_s10, 32 }
  0x81   :  { %p2376_p11 = scmp.ne.s32.totalorder %s225_s10, %s2375_s8  ;;  %p2380_p12 = scmp.lt.s32.totalorder %s225_s10, %s225_s10 }
  0x82   :  { %p2381_p13 = scmp.lt.s32.totalorder %s2379_s15, %s2375_s8 }
  0x84   :  { %p2382_p0 = por %p2381_p13, %p2380_p12 }
  0x86   :  { %p2383_p1 = pnand %p2382_p0, %p2376_p11 }
  0x88   :  { %2386 = shalt.err (!%p2383_p1)
}
  0x89   :  { %227 = dma.hbm_to_vmem [thread:$0]  %s2981_s4, 16, %s225_s10, [#allocation21]  }
  0x8a   :  { %s2860_s19 = smov [#allocation23]   ;;  %s2861_s18 = smov [#allocation26]  }
  0x8b   :  { %s244_s16 = sshll.u32 %s2860_s19, 4  ;;  %s264_s22 = sshll.u32 %s2861_s18, 4  ;;  %s245_s16 = int_to_ptr.vmem [resolvable:$true] %s244_s16  ;;  %s265_s22 = int_to_ptr.vmem [resolvable:$true] %s264_s22 }
  0x8c   :  { %s2395_s23 = scalar_lea.vmem %s245_s16, 16  ;;  %s2399_s26 = scalar_lea.vmem %s245_s16, 32 }
  0x8d   :  { %p2396_p2 = scmp.ne.s32.totalorder %s245_s16, %s2395_s23  ;;  %p2400_p3 = scmp.lt.s32.totalorder %s245_s16, %s245_s16 }
  0x8e   :  { %p2401_p4 = scmp.lt.s32.totalorder %s2399_s26, %s2395_s23 }
  0x90   :  { %p2402_p5 = por %p2401_p4, %p2400_p3 }
  0x92   :  { %p2403_p6 = pnand %p2402_p5, %p2396_p2 }
  0x94   :  { %2406 = shalt.err (!%p2403_p6)
}
  0x95   :  { %247 = dma.hbm_to_vmem [thread:$0]  %s2991_s30, 16, %s245_s16, [#allocation24]  }
  0x96   :  { %s2415_s6 = scalar_lea.vmem %s265_s22, 16  ;;  %s2419_s28 = scalar_lea.vmem %s265_s22, 32 }
  0x97   :  { %p2416_p7 = scmp.ne.s32.totalorder %s265_s22, %s2415_s6  ;;  %p2420_p8 = scmp.lt.s32.totalorder %s265_s22, %s265_s22 }
  0x98   :  { %p2421_p9 = scmp.lt.s32.totalorder %s2419_s28, %s2415_s6 }
  0x9a   :  { %p2422_p10 = por %p2421_p9, %p2420_p8 }
  0x9c   :  { %p2423_p11 = pnand %p2422_p10, %p2416_p7 }
  0x9e   :  { %2426 = shalt.err (!%p2423_p11)
}
  0x9f   :  { %267 = dma.hbm_to_vmem [thread:$0]  %s3001_s9, 16, %s265_s22, [#allocation27]  }
  0xa0   :  { %s2862_s4 = smov [#allocation29]   ;;  %s2863_s17 = smov [#allocation32]  }
  0xa1   :  { %s284_s1 = sshll.u32 %s2862_s4, 4  ;;  %s304_s25 = sshll.u32 %s2863_s17, 4  ;;  %s285_s1 = int_to_ptr.vmem [resolvable:$true] %s284_s1  ;;  %s305_s25 = int_to_ptr.vmem [resolvable:$true] %s304_s25 }
  0xa2   :  { %s2435_s2 = scalar_lea.vmem %s285_s1, 16  ;;  %s2439_s7 = scalar_lea.vmem %s285_s1, 32 }
  0xa3   :  { %p2436_p12 = scmp.ne.s32.totalorder %s285_s1, %s2435_s2  ;;  %p2440_p13 = scmp.lt.s32.totalorder %s285_s1, %s285_s1 }
  0xa4   :  { %p2441_p0 = scmp.lt.s32.totalorder %s2439_s7, %s2435_s2 }
  0xa6   :  { %p2442_p1 = por %p2441_p0, %p2440_p13 }
  0xa8   :  { %p2443_p2 = pnand %p2442_p1, %p2436_p12 }
  0xaa   :  { %2446 = shalt.err (!%p2443_p2)
}
  0xab   :  { %287 = dma.hbm_to_vmem [thread:$0]  %s3011_s29, 16, %s285_s1, [#allocation30]  }
  0xac   :  { %s2455_s30 = scalar_lea.vmem %s305_s25, 32  ;;  %p2460_p4 = scmp.lt.s32.totalorder %s305_s25, %s305_s25 }
  0xad   :  { %p2456_p3 = scmp.ne.s32.totalorder %s305_s25, %s2455_s30  ;;  %p2461_p5 = scmp.lt.s32.totalorder %s2455_s30, %s2455_s30 }
  0xaf   :  { %p2462_p6 = por %p2461_p5, %p2460_p4 }
  0xb1   :  { %p2463_p7 = pnand %p2462_p6, %p2456_p3 }
  0xb3   :  { %2466 = shalt.err (!%p2463_p7)
}
  0xb4   :  { %307 = dma.hbm_to_vmem [thread:$0]  %s3021_s12, 32, %s305_s25, [#allocation33]  }
  0xb5   :  { %s2864_s9 = smov [#allocation2]   ;;  %s2865_s11 = smov [#allocation7]  }
  0xb6   :  { %s106_s10 = sshll.u32 %s2864_s9, 4  ;;  %s126_s0 = sshll.u32 %s2865_s11, 4  ;;  %s107_s10 = int_to_ptr.vmem [resolvable:$true] %s106_s10  ;;  %s127_s0 = int_to_ptr.vmem [resolvable:$true] %s126_s0 }
  0xb7   :  { %s2475_s8 = scalar_lea.vmem %s107_s10, 64  ;;  %p2480_p9 = scmp.lt.s32.totalorder %s107_s10, %s107_s10 }
  0xb8   :  { %p2476_p8 = scmp.ne.s32.totalorder %s107_s10, %s2475_s8  ;;  %p2481_p10 = scmp.lt.s32.totalorder %s2475_s8, %s2475_s8 }
  0xba   :  { %p2482_p11 = por %p2481_p10, %p2480_p9 }
  0xbc   :  { %p2483_p12 = pnand %p2482_p11, %p2476_p8 }
  0xbe   :  { %2486 = shalt.err (!%p2483_p12)
}
  0xbf   :  { %109 = dma.hbm_to_vmem [thread:$0]  %s2906_s13, 64, %s107_s10, [#allocation3]  }
  0xc0   :  { %s2495_s29 = scalar_lea.vmem %s127_s0, 64  ;;  %p2500_p0 = scmp.lt.s32.totalorder %s127_s0, %s127_s0 }
  0xc1   :  { %p2496_p13 = scmp.ne.s32.totalorder %s127_s0, %s2495_s29  ;;  %p2501_p1 = scmp.lt.s32.totalorder %s2495_s29, %s2495_s29 }
  0xc3   :  { %p2502_p2 = por %p2501_p1, %p2500_p0 }
  0xc5   :  { %p2503_p3 = pnand %p2502_p2, %p2496_p13 }
  0xc7   :  { %2506 = shalt.err (!%p2503_p3)
}
  0xc8   :  { %129 = dma.hbm_to_vmem [thread:$0]  %s2916_s21, 64, %s127_s0, [#allocation6]  }
  0xc9   :  { %s2866_s12 = smov [#allocation10]   ;;  %s2867_s19 = smov [#allocation13]  }
  0xca   :  { %s148_s15 = sshll.u32 %s2866_s12, 4  ;;  %s168_s16 = sshll.u32 %s2867_s19, 4  ;;  %s149_s15 = int_to_ptr.vmem [resolvable:$true] %s148_s15  ;;  %s169_s16 = int_to_ptr.vmem [resolvable:$true] %s168_s16 }
  0xcb   :  { %s2515_s18 = scalar_lea.vmem %s149_s15, 16  ;;  %s2519_s22 = scalar_lea.vmem %s149_s15, 32 }
  0xcc   :  { %p2516_p4 = scmp.ne.s32.totalorder %s149_s15, %s2515_s18  ;;  %p2520_p5 = scmp.lt.s32.totalorder %s149_s15, %s149_s15 }
  0xcd   :  { %p2521_p6 = scmp.lt.s32.totalorder %s2519_s22, %s2515_s18 }
  0xcf   :  { %p2522_p7 = por %p2521_p6, %p2520_p5 }
  0xd1   :  { %p2523_p8 = pnand %p2522_p7, %p2516_p4 }
  0xd3   :  { %2526 = shalt.err (!%p2523_p8)
}
  0xd4   :  { %151 = dma.hbm_to_vmem [thread:$0]  %s2931_s3, 16, %s149_s15, [#allocation9]  }
  0xd5   :  { %s2535_s13 = scalar_lea.vmem %s169_s16, 16  ;;  %s2539_s23 = scalar_lea.vmem %s169_s16, 32 }
  0xd6   :  { %p2536_p9 = scmp.ne.s32.totalorder %s169_s16, %s2535_s13  ;;  %p2540_p10 = scmp.lt.s32.totalorder %s169_s16, %s169_s16 }
  0xd7   :  { %p2541_p11 = scmp.lt.s32.totalorder %s2539_s23, %s2535_s13 }
  0xd9   :  { %p2542_p12 = por %p2541_p11, %p2540_p10 }
  0xdb   :  { %p2543_p13 = pnand %p2542_p12, %p2536_p9 }
  0xdd   :  { %2546 = shalt.err (!%p2543_p13)
}
  0xde   :  { %171 = dma.hbm_to_vmem [thread:$0]  %s2941_s14, 16, %s169_s16, [#allocation12]  }
  0xdf   :  { %s2868_s21 = smov [#allocation16]   ;;  %s2869_s6 = smov [#allocation19]  }
  0xe0   :  { %s188_s26 = sshll.u32 %s2868_s21, 4  ;;  %s212_s28 = sshll.u32 %s2869_s6, 4  ;;  %s189_s26 = int_to_ptr.vmem [resolvable:$true] %s188_s26  ;;  %s213_s28 = int_to_ptr.vmem [resolvable:$true] %s212_s28 }
  0xe1   :  { %s2555_s4 = scalar_lea.vmem %s189_s26, 16  ;;  %s2559_s1 = scalar_lea.vmem %s189_s26, 32 }
  0xe2   :  { %p2556_p0 = scmp.ne.s32.totalorder %s189_s26, %s2555_s4  ;;  %p2560_p1 = scmp.lt.s32.totalorder %s189_s26, %s189_s26 }
  0xe3   :  { %p2561_p2 = scmp.lt.s32.totalorder %s2559_s1, %s2555_s4 }
  0xe5   :  { %p2562_p3 = por %p2561_p2, %p2560_p1 }
  0xe7   :  { %p2563_p4 = pnand %p2562_p3, %p2556_p0 }
  0xe9   :  { %2566 = shalt.err (!%p2563_p4)
}
  0xea   :  { %s3305_s3 = sld [smem:[#allocation61_spill]]  ;;  %s2575_s17 = scalar_lea.vmem %s213_s28, 16 }
  0xeb   :  { %p2576_p5 = scmp.ne.s32.totalorder %s213_s28, %s2575_s17  ;;  %s2579_s25 = scalar_lea.vmem %s213_s28, 32 }
  0xec   :  { %p2580_p6 = scmp.lt.s32.totalorder %s213_s28, %s213_s28  ;;  %p2581_p7 = scmp.lt.s32.totalorder %s2579_s25, %s2575_s17 }
  0xee   :  { %p2582_p8 = por %p2581_p7, %p2580_p6 }
  0xf0   :  { %191 = dma.hbm_to_vmem [thread:$0]  %s3305_s3, 16, %s189_s26, [#allocation15]  }
  0xf1   :  { %p2583_p9 = pnand %p2582_p8, %p2576_p5 }
  0xf3   :  { %2586 = shalt.err (!%p2583_p9)
}
  0xf4   :  { %s3306_s14 = sld [smem:[#allocation64_spill]]  ;;  %s2870_s2 = smov [#allocation22]  }
  0xf5   :  { %s234_s7 = sshll.u32 %s2870_s2, 4  ;;  %s2871_s30 = smov [#allocation25]   ;;  %s235_s7 = int_to_ptr.vmem [resolvable:$true] %s234_s7 }
  0xf6   :  { %s254_s9 = sshll.u32 %s2871_s30, 4  ;;  %s2595_s10 = scalar_lea.vmem %s235_s7, 64  ;;  %s255_s9 = int_to_ptr.vmem [resolvable:$true] %s254_s9 }
  0xf7   :  { %p2596_p10 = scmp.ne.s32.totalorder %s235_s7, %s2595_s10  ;;  %p2600_p11 = scmp.lt.s32.totalorder %s235_s7, %s235_s7 }
  0xf8   :  { %p2601_p12 = scmp.lt.s32.totalorder %s2595_s10, %s2595_s10 }
  0xfa   :  { %215 = dma.hbm_to_vmem [thread:$0]  %s3306_s14, 16, %s213_s28, [#allocation18]  }
  0xfb   :  { %p2602_p13 = por %p2601_p12, %p2600_p11 }
  0xfd   :  { %p2603_p0 = pnand %p2602_p13, %p2596_p10 }
  0xff   :  { %2606 = shalt.err (!%p2603_p0)
}
 0x100   :  { %s3307_s11 = sld [smem:[#allocation66_spill]]  ;;  %s2615_s0 = scalar_lea.vmem %s255_s9, 64 }
 0x101   :  { %p2616_p1 = scmp.ne.s32.totalorder %s255_s9, %s2615_s0  ;;  %p2620_p2 = scmp.lt.s32.totalorder %s255_s9, %s255_s9 }
 0x102   :  { %p2621_p3 = scmp.lt.s32.totalorder %s2615_s0, %s2615_s0 }
 0x104   :  { %p2622_p4 = por %p2621_p3, %p2620_p2 }
 0x106   :  { %237 = dma.hbm_to_vmem [thread:$0]  %s3307_s11, 64, %s235_s7, [#allocation21]  }
 0x107   :  { %p2623_p5 = pnand %p2622_p4, %p2616_p1 }
 0x109   :  { %2626 = shalt.err (!%p2623_p5)
}
 0x10a   :  { %s3308_s8 = sld [smem:[#allocation67_spill]]  ;;  %s2872_s29 = smov [#allocation28]  }
 0x10b   :  { %s274_s12 = sshll.u32 %s2872_s29, 4  ;;  %s2873_s15 = smov [#allocation31]   ;;  %s275_s12 = int_to_ptr.vmem [resolvable:$true] %s274_s12 }
 0x10c   :  { %s294_s19 = sshll.u32 %s2873_s15, 4  ;;  %s2635_s16 = scalar_lea.vmem %s275_s12, 64  ;;  %s295_s19 = int_to_ptr.vmem [resolvable:$true] %s294_s19 }
 0x10d   :  { %p2636_p6 = scmp.ne.s32.totalorder %s275_s12, %s2635_s16  ;;  %p2640_p7 = scmp.lt.s32.totalorder %s275_s12, %s275_s12 }
 0x10e   :  { %p2641_p8 = scmp.lt.s32.totalorder %s2635_s16, %s2635_s16 }
 0x110   :  { %257 = dma.hbm_to_vmem [thread:$0]  %s3308_s8, 64, %s255_s9, [#allocation24]  }
 0x111   :  { %p2642_p9 = por %p2641_p8, %p2640_p7 }
 0x113   :  { %p2643_p10 = pnand %p2642_p9, %p2636_p6 }
 0x115   :  { %2646 = shalt.err (!%p2643_p10)
}
 0x116   :  { %s3309_s18 = sld [smem:[#allocation68_spill]]  ;;  %s2655_s22 = scalar_lea.vmem %s295_s19, 32 }
 0x117   :  { %p2656_p11 = scmp.ne.s32.totalorder %s295_s19, %s2655_s22  ;;  %p2660_p12 = scmp.lt.s32.totalorder %s295_s19, %s295_s19 }
 0x118   :  { %p2661_p13 = scmp.lt.s32.totalorder %s2655_s22, %s2655_s22 }
 0x11a   :  { %p2662_p0 = por %p2661_p13, %p2660_p12 }
 0x11c   :  { %277 = dma.hbm_to_vmem [thread:$0]  %s3309_s18, 64, %s275_s12, [#allocation27]  }
 0x11d   :  { %p2663_p1 = pnand %p2662_p0, %p2656_p11 }
 0x11f   :  { %2666 = shalt.err (!%p2663_p1)
}
 0x120   :  { %s3310_s13 = sld [smem:[#allocation69_spill]]  ;;  %s2874_s23 = smov [#allocation34]  }
 0x121   :  { %s314_s21 = sshll.u32 %s2874_s23, 4  ;;  %s2875_s26 = smov [#allocation35]   ;;  %s315_s21 = int_to_ptr.vmem [resolvable:$true] %s314_s21 }
 0x122   :  { %s324_s6 = sshll.u32 %s2875_s26, 4  ;;  %s2675_s28 = scalar_lea.vmem %s315_s21, 32  ;;  %s325_s6 = int_to_ptr.vmem [resolvable:$true] %s324_s6 }
 0x123   :  { %p2676_p2 = scmp.ne.s32.totalorder %s315_s21, %s2675_s28  ;;  %p2680_p3 = scmp.lt.s32.totalorder %s315_s21, %s315_s21 }
 0x124   :  { %p2681_p4 = scmp.lt.s32.totalorder %s2675_s28, %s2675_s28 }
 0x126   :  { %297 = dma.hbm_to_vmem [thread:$0]  %s3310_s13, 32, %s295_s19, [#allocation30]  }
 0x127   :  { %p2682_p5 = por %p2681_p4, %p2680_p3 }
 0x129   :  { %p2683_p6 = pnand %p2682_p5, %p2676_p2 }
 0x12b   :  { %2686 = shalt.err (!%p2683_p6)
}
 0x12c   :  { %s3311_s4 = sld [smem:[#allocation70_spill]]  ;;  %s2695_s1 = scalar_lea.vmem %s325_s6, 32 }
 0x12d   :  { %p2696_p7 = scmp.ne.s32.totalorder %s325_s6, %s2695_s1  ;;  %p2700_p8 = scmp.lt.s32.totalorder %s325_s6, %s325_s6 }
 0x12e   :  { %p2701_p9 = scmp.lt.s32.totalorder %s2695_s1, %s2695_s1 }
 0x130   :  { %p2702_p10 = por %p2701_p9, %p2700_p8 }
 0x132   :  { %317 = dma.hbm_to_vmem [thread:$0]  %s3311_s4, 32, %s315_s21, [#allocation33]  }
 0x133   :  { %p2703_p11 = pnand %p2702_p10, %p2696_p7 }
 0x135   :  { %2706 = shalt.err (!%p2703_p11)
}
 0x136   :  { %s3312_s3 = sld [smem:[#allocation71_spill]] }
 0x13c   :  { %327 = dma.hbm_to_vmem [thread:$0]  %s3312_s3, 32, %s325_s6, [#allocation36]  }
 0x13d   :  { %2787 = dma.done.wait [#allocation3], 64  }
 0x13e   :  { %2788 = vsyncadd [#allocation3], 4294967232 }
 0x13f   :  { %2789 = dma.done.wait [#allocation6], 96  }
 0x140   :  { %2790 = vsyncadd [#allocation6], 4294967200 }
 0x141   :  { %2791 = dma.done.wait [#allocation9], 32  }
 0x142   :  { %2792 = vsyncadd [#allocation9], 4294967264 }
 0x143   :  { %2793 = dma.done.wait [#allocation12], 80  }
 0x144   :  { %2794 = vsyncadd [#allocation12], 4294967216 }
 0x145   :  { %2795 = dma.done.wait [#allocation15], 80  }
 0x146   :  { %2796 = vsyncadd [#allocation15], 4294967216 }
 0x147   :  { %2797 = dma.done.wait [#allocation18], 32  }
 0x148   :  { %2798 = vsyncadd [#allocation18], 4294967264 }
 0x149   :  { %2799 = dma.done.wait [#allocation21], 80  }
 0x14a   :  { %2800 = vsyncadd [#allocation21], 4294967216 }
 0x14b   :  { %2801 = dma.done.wait [#allocation24], 80  }
 0x14c   :  { %2802 = vsyncadd [#allocation24], 4294967216 }
 0x14d   :  { %2803 = dma.done.wait [#allocation27], 80  }
 0x14e   :  { %2804 = vsyncadd [#allocation27], 4294967216 }
 0x14f   :  { %2805 = dma.done.wait [#allocation30], 48  }
 0x150   :  { %2806 = vsyncadd [#allocation30], 4294967248 }
 0x151   :  { %2807 = dma.done.wait [#allocation33], 64  }
 0x152   :  { %2808 = vsyncadd [#allocation33], 4294967232 }
 0x153   :  { %2809 = dma.done.wait [#allocation36], 32  }
 0x154   :  { %2810 = vsyncadd [#allocation36], 4294967264  ;;  %s3313_s17 = sld [smem:[#allocation60_spill]]  ;;  %v2876_v0 = vmov 0.0   ;;  %vm2877_vm0 = vmmov 0   ;;  %vm430_vm1 = vcmask 1043456  }
 0x155   :  { %s3314_s25 = sld [smem:[#allocation58_spill]]  ;;  %2037 = vmatprep.subr.bf16.mxu0 %v2876_v0  ;;  %2043 = vmatprep.subr.bf16.mxu1 %v2876_v0  ;;  %vm426_vm2 = vcmask 64512   ;;  %v413_v1 = vld [vmem:[#allocation7] sm:$0xf]  ;;  %vm495_vm3 = vcmask 130048   ;;  %vm983_vm4 = vcmask 1045504  }
 0x156   :  { %s3315_s14 = sld [smem:[#allocation59_spill]]  ;;  %2039 = vmatprep.mubr.msk.bf16.mxu0 %vm2877_vm0, %v2876_v0  ;;  %2045 = vmatprep.mubr.msk.bf16.mxu1 %vm2877_vm0, %v2876_v0  ;;  %v432_v2 = vsel %vm430_vm1, %v413_v1, 0  ;;  %v540_v6 = vld [vmem:[#allocation11] sm:$0xf]  ;;  %v592_v7 = vld [vmem:[#allocation14] sm:$0xf] }
 0x157   :  { %2038 = vmatpush3.bf16.msra.mxu0 %v432_v2  ;;  %s3316_s2 = sld [smem:[#allocation62_spill]]  ;;  %v549_v8 = vsel %vm430_vm1, %v540_v6, 0  ;;  %v601_v9 = vsel %vm430_vm1, %v592_v7, 0  ;;  %v812_v13 = vld [vmem:[#allocation22] sm:$0xf]  ;;  %vm979_vm5 = vcmask 97280  }
 0x158   :  { %s3317_s7 = sld [smem:[#allocation63_spill]]  ;;  %2049 = vmatprep.subr.bf16.mxu0 %v2876_v0  ;;  %v824_v14 = vsel %vm430_vm1, %v812_v13, 0  ;;  %v866_v15 = vld [vmem:[#allocation25] sm:$0xf]  ;;  %v411_v17 = vld [vmem:[#allocation2] sm:$0xf] }
 0x159   :  { %s3318_s30 = sld [smem:[#allocation65_spill]]  ;;  %v875_v16 = vsel %vm430_vm1, %v866_v15, 0  ;;  %v917_v18 = vld [vmem:[#allocation28] sm:$0xf]  ;;  %v412_v20 = vld [vmem:[#allocation5] sm:$0x3] }
 0x15a   :  { %v2243_v3 = vld [vmem:[%s3313_s17] sm:$0xff]   ;;  %v929_v19 = vsel %vm430_vm1, %v917_v18, 0  ;;  %s3319_s9 = sld [smem:[#allocation75_spill]]  ;;  %v1952_v30 = vld [vmem:[#allocation16] ss:$0 sm:$0xff]  ;;  %vm1202_vm6 = vcmask 261120  }
 0x15b   :  { %v2244_v4 = vld [vmem:[%s3314_s25] sm:$0xff]   ;;  %2044 = vmatpush3.bf16.msra.mxu1 %v2243_v3  ;;  %v1957_v50 = vld [vmem:[#allocation19] ss:$0 sm:$0xff]  ;;  %v1960_v52 = vld [vmem:[#allocation20] ss:$0 sm:$0xff]  ;;  %s3320_s10 = sld [smem:[#allocation74_spill]] }
 0x15c   :  { %v2245_v5 = vld [vmem:[%s3315_s14] sm:$0x3f]   ;;  %2055 = vmatprep.subr.bf16.mxu1 %v2876_v0  ;;  %2040 = vmatmul.mubr.msk.bf16.vlgmr.msra.gmra.mxu0 %vm426_vm2, %v2244_v4  ;;  %v1965_v62 = vld [vmem:[#allocation26] ss:$0 sm:$0xff]  ;;  %s3321_s11 = sld [smem:[#allocation77_spill]]  ;;  %vm1091_vm7 = vcmask 125952  }
 0x15d   :  { %2050 = vmatpush3.bf16.msra.mxu0 %v549_v8  ;;  %2051 = vmatprep.mubr.msk.bf16.mxu0 %vm2877_vm0, %v2876_v0  ;;  %v2246_v10 = vld [vmem:[%s3316_s2] sm:$0xff]   ;;  %s3322_s0 = sld [smem:[#allocation76_spill]]  ;;  %v1954_v15 = vld [vmem:[#allocation17] ss:$0 sm:$0xff]  ;;  %s2880_s12 = smov 112  }
 0x15e   :  { %2046 = vmatmul.mubr.msk.bf16.vlgmr.msra.gmra.mxu1 %vm495_vm3, %v2245_v5  ;;  %2061 = vmatprep.subr.bf16.mxu0 %v2876_v0  ;;  %v2248_v11 = vld [vmem:[%s3317_s7] sm:$0xff]   ;;  %s3323_s8 = sld [smem:[#allocation72_spill]]  ;;  %s2881_s15 = smov [#allocation38]  }
 0x15f   :  { %2056 = vmatpush3.bf16.msra.mxu1 %v601_v9  ;;  %2057 = vmatprep.mubr.msk.bf16.mxu1 %vm2877_vm0, %v2876_v0  ;;  %v2247_v12 = vld [vmem:[%s3318_s30] sm:$0xff]   ;;  %s3324_s29 = sld [smem:[#allocation73_spill]]  ;;  %s1852_s19 = sshll.u32 %s2881_s15, 4  ;;  %s1853_s19 = int_to_ptr.vmem [resolvable:$true] %s1852_s19 }
 0x160   :  { %2067 = vmatprep.subr.bf16.mxu1 %v2876_v0  ;;  %v2249_v42 = vld [vmem:[%s3319_s9] sm:$0x3f]   ;;  %s2882_s16 = smov [#allocation37]   ;;  %s2707_s22 = scalar_lea.vmem %s1853_s19, 256 }
 0x161   :  { %v2250_v7 = vld [vmem:[%s3320_s10] sm:$0xff]   ;;  %s1840_s18 = sshll.u32 %s2882_s16, 4  ;;  %p2708_p12 = scmp.ne.s32.totalorder %s1853_s19, %s2707_s22  ;;  %s1841_s18 = int_to_ptr.vmem [resolvable:$true] %s1840_s18 }
 0x162   :  { %v1950_v18 = vld [vmem:[#allocation13] ss:$0 sm:$0xff]  ;;  %p2712_p13 = scmp.lt.s32.totalorder %s1853_s19, %s1853_s19  ;;  %p2713_p0 = scmp.lt.s32.totalorder %s2707_s22, %s2707_s22 }
 0x164   :  { %2052 = vmatmul.mubr.msk.bf16.vlgmr.msra.gmra.mxu0 %vm426_vm2, %v2244_v4  ;;  %p2714_p1 = por %p2713_p0, %p2712_p13 }
 0x165   :  { %2062 = vmatpush3.bf16.msra.mxu0 %v2246_v10  ;;  %2063 = vmatprep.mubr.msk.bf16.mxu0 %vm2877_vm0, %v2876_v0 }
 0x166   :  { %2058 = vmatmul.mubr.msk.bf16.vlgmr.msra.gmra.mxu1 %vm426_vm2, %v2244_v4  ;;  %2073 = vmatprep.subr.bf16.mxu0 %v2876_v0  ;;  %p2715_p2 = pnand %p2714_p1, %p2708_p12 }
 0x167   :  { %2068 = vmatpush3.bf16.msra.mxu1 %v2248_v11  ;;  %2069 = vmatprep.mubr.msk.bf16.mxu1 %vm2877_vm0, %v2876_v0 }
 0x168   :  { %2079 = vmatprep.subr.bf16.mxu1 %v2876_v0 }
 0x16c   :  { %2064 = vmatmul.mubr.msk.bf16.vlgmr.msra.gmra.mxu0 %vm495_vm3, %v2245_v5 }
 0x16d   :  { %2074 = vmatpush3.bf16.msra.mxu0 %v2247_v12  ;;  %2075 = vmatprep.mubr.msk.bf16.mxu0 %vm2877_vm0, %v2876_v0 }
 0x16e   :  { %2070 = vmatmul.mubr.msk.bf16.vlgmr.msra.gmra.mxu1 %vm495_vm3, %v2245_v5  ;;  %2085 = vmatprep.subr.bf16.mxu0 %v2876_v0 }
 0x16f   :  { %2080 = vmatpush3.bf16.msra.mxu1 %v824_v14  ;;  %2081 = vmatprep.mubr.msk.bf16.mxu1 %vm2877_vm0, %v2876_v0  ;;  %v1142_v14 = vld [vmem:[%s3321_s11] sm:$0x3] }
 0x170   :  { %2091 = vmatprep.subr.bf16.mxu1 %v2876_v0 }
 0x174   :  { %2076 = vmatmul.mubr.msk.bf16.vlgmr.msra.gmra.mxu0 %vm495_vm3, %v2245_v5 }
 0x175   :  { %2086 = vmatpush3.bf16.msra.mxu0 %v875_v16  ;;  %2087 = vmatprep.mubr.msk.bf16.mxu0 %vm2877_vm0, %v2876_v0 }
 0x176   :  { %2082 = vmatmul.mubr.msk.bf16.vlgmr.msra.gmra.mxu1 %vm426_vm2, %v411_v17  ;;  %2097 = vmatprep.subr.bf16.mxu0 %v2876_v0 }
 0x177   :  { %2093 = vmatprep.mubr.msk.bf16.mxu1 %vm2877_vm0, %v2876_v0  ;;  %2092 = vmatpush3.bf16.msra.mxu1 %v929_v19 }
 0x178   :  { %2103 = vmatprep.subr.bf16.mxu1 %v2876_v0 }
 0x17c   :  { %2088 = vmatmul.mubr.msk.bf16.vlgmr.msra.gmra.mxu0 %vm426_vm2, %v411_v17  ;;  %v1093_v17 = vld [vmem:[%s3322_s0] sm:$0x3] }
 0x17d   :  { %2099 = vmatprep.mubr.msk.bf16.mxu0 %vm2877_vm0, %v2876_v0 }
 0x17e   :  { %2094 = vmatmul.mubr.msk.bf16.vlgmr.msra.gmra.mxu1 %vm426_vm2, %v412_v20 }
 0x17f   :  { %2105 = vmatprep.mubr.msk.bf16.mxu1 %vm2877_vm0, %v2876_v0 }
 0x21c   :  { %v3163_v21 = vpop.f32.mrf.mxu0 }
 0x21e   :  { %v3165_v22 = vpop.f32.mrf.mxu1  ;;  %v2041_v23 = vpop.f32.mrf.mxu0 }
 0x21f   :  { %v1282_v23 = vld [vmem:[#allocation34] sm:$0x3] }
 0x220   :  { %v2047_v24 = vpop.f32.mrf.mxu1  ;;  %v3167_v25 = vpop.f32.mrf.mxu0 }
 0x221   :  { %v1963_v24 = vld [vmem:[#allocation23] ss:$0 sm:$0xff] }
 0x222   :  { %v3169_v26 = vpop.f32.mrf.mxu1  ;;  %v2042_v27 = vpop.f32.mrf.mxu0 }
 0x223   :  { %v1439_v27 = vld [vmem:[#allocation35] sm:$0x3] }
 0x224   :  { %v2048_v28 = vpop.f32.mrf.mxu1  ;;  %v3171_v29 = vpop.f32.mrf.mxu0 }
 0x225   :  { %v586_v28 = vadd.f32 %v1950_v18, %v3171_v29 }
 0x226   :  { %v637_v31 = vpop.f32.mrf.mxu1  ;;  %v2053_v32 = vpop.f32.mrf.mxu0 }
 0x227   :  { %v638_v34 = vadd.f32 %v1952_v30, %v637_v31  ;;  %v1201_v32 = vld [vmem:[#allocation31] sm:$0x3] }
 0x228   :  { %v2059_v33 = vpop.f32.mrf.mxu1  ;;  %v3173_v35 = vpop.f32.mrf.mxu0 }
 0x229   :  { %v589_v19 = vadd.f32 %v1950_v18, %v3173_v35  ;;  %v1362_v33 = vld [vmem:[#allocation32] sm:$0x3] }
 0x22a   :  { %v640_v36 = vpop.f32.mrf.mxu1  ;;  %v2054_v38 = vpop.f32.mrf.mxu0 }
 0x22b   :  { %v641_v37 = vadd.f32 %v1952_v30, %v640_v36 }
 0x22c   :  { %v2060_v39 = vpop.f32.mrf.mxu1  ;;  %v693_v41 = vpop.f32.mrf.mxu0 }
 0x22d   :  { %v1036_v40 = vpack.c.bf16 %v641_v37, %v638_v34  ;;  %v694_v20 = vadd.f32 %v1954_v15, %v693_v41  ;;  %v3226_v34 = vpack.c.bf16 %v589_v19, %v586_v28  ;;  %v2878_v39 = vmov 1   ;;  %v1946_v41 = vld [vmem:[#allocation10] ss:$0 sm:$0xff] }
 0x22e   :  { %v2065_v43 = vpop.f32.mrf.mxu0  ;;  %v749_v44 = vpop.f32.mrf.mxu1  ;;  %2241 = vset.pattern.permute.xlu1 %v2878_v39 }
 0x22f   :  { %2104 = vmatpush3.bf16.msra.mxu1 %v1036_v40  ;;  %v750_v55 = vadd.f32 %v1957_v50, %v749_v44  ;;  %v2879_v40 = vmov 0  }
 0x230   :  { %2115 = vmatprep.subr.bf16.mxu1 %v2876_v0  ;;  %v696_v45 = vpop.f32.mrf.mxu0  ;;  %v2071_v46 = vpop.f32.mrf.mxu1  ;;  %2240 = vset.pattern.permute.xlu0 %v2879_v40 }
 0x231   :  { %v697_v16 = vadd.f32 %v1954_v15, %v696_v45  ;;  %v537_v46 = vadd.f32 %v1946_v41, %v3169_v26  ;;  %v1967_v26 = vld [vmem:[#allocation29] ss:$0 sm:$0xff] }
 0x232   :  { %2106 = vmatmul.mubr.msk.bf16.vlgmr.msra.gmra.mxu1 %vm495_vm3, %v2249_v42  ;;  %v2066_v47 = vpop.f32.mrf.mxu0  ;;  %v752_v48 = vpop.f32.mrf.mxu1  ;;  %v534_v42 = vadd.f32 %v1946_v41, %v3165_v22 }
 0x233   :  { %2117 = vmatprep.mubr.msk.bf16.mxu1 %vm2877_vm0, %v2876_v0  ;;  %v753_v56 = vadd.f32 %v1957_v50, %v752_v48  ;;  %v3206_v30 = vpack.c.bf16 %v697_v16, %v694_v20 }
 0x234   :  { %v805_v49 = vpop.f32.mrf.mxu0  ;;  %v2072_v51 = vpop.f32.mrf.mxu1 }
 0x235   :  { %v806_v59 = vadd.f32 %v1960_v52, %v805_v49  ;;  %v1094_v2 = vpack.c.bf16 %v753_v56, %v750_v55  ;;  %v1623_v29 = vsel %vm983_vm4, %v3206_v30, 0 }
 0x236   :  { %v2077_v53 = vpop.f32.mrf.mxu0  ;;  %v860_v54 = vpop.f32.mrf.mxu1 }
 0x237   :  { %v1099_v10 = vsel %vm983_vm4, %v1094_v2, 0  ;;  %v3209_v31 = vadd.f32 %v1963_v24, %v860_v54 }
 0x238   :  { %v808_v57 = vpop.f32.mrf.mxu0  ;;  %v2083_v58 = vpop.f32.mrf.mxu1 }
 0x239   :  { %v809_v60 = vadd.f32 %v1960_v52, %v808_v57  ;;  %v1943_v52 = vld [vmem:[#allocation8] ss:$0 sm:$0xff] }
 0x23a   :  { %v2078_v61 = vpop.f32.mrf.mxu0  ;;  %v863_v63 = vpop.f32.mrf.mxu1  ;;  %v469_v53 = vadd.f32 %v1943_v52, %v3163_v21  ;;  %v472_v56 = vadd.f32 %v1943_v52, %v3167_v25 }
 0x23b   :  { %v973_v1 = vpack.c.bf16 %v809_v60, %v806_v59 }
 0x23c   :  { %v911_v3 = vpop.f32.mrf.mxu0  ;;  %v2084_v4 = vpop.f32.mrf.mxu1 }
 0x23d   :  { %v912_v5 = vadd.f32 %v1965_v62, %v911_v3  ;;  %v985_v6 = vsel %vm983_vm4, %v973_v1, 0 }
 0x23e   :  { %2098 = vmatpush3.bf16.msra.mxu0 %v985_v6  ;;  %v2089_v8 = vpop.f32.mrf.mxu0  ;;  %v965_v35 = vpop.f32.mrf.mxu1 }
 0x23f   :  { %v1143_v9 = vpack.c.bf16 %v912_v5, %v912_v5  ;;  %2109 = vmatprep.subr.bf16.mxu0 %v2876_v0  ;;  %v966_v63 = vadd.f32 %v1967_v26, %v965_v35 }
 0x240   :  { %v914_v11 = vpop.f32.mrf.mxu0  ;;  %v2095_v36 = vpop.f32.mrf.mxu1 }
 0x241   :  { %v1148_v12 = vsel %vm430_vm1, %v1143_v9, 0  ;;  %2100 = vmatmul.mubr.msk.bf16.vlgmr.msra.gmra.mxu0 %vm979_vm5, %v2250_v7 }
 0x242   :  { %2110 = vmatpush3.bf16.msra.mxu0 %v1099_v10  ;;  %2116 = vmatpush3.bf16.msra.mxu1 %v1148_v12  ;;  %v2090_v13 = vpop.f32.mrf.mxu0  ;;  %v968_v37 = vpop.f32.mrf.mxu1 }
 0x243   :  { %2128 = vmatprep.subr.mxu1 %v2876_v0  ;;  %2111 = vmatprep.mubr.msk.bf16.mxu0 %vm2877_vm0, %v2876_v0 }
 0x244   :  { %2121 = vmatprep.subr.mxu0 %v2876_v0  ;;  %v2096_v38 = vpop.f32.mrf.mxu1 }
 0x245   :  { %2118 = vmatmul.mubr.msk.bf16.vlgmr.msra.gmra.mxu1 %vm426_vm2, %v1142_v14 }
 0x246   :  { %2129 = vmatpush3.xpose.msk.msra.mxu1 %vm1202_vm6, %v697_v16  ;;  %2132 = vmatprep.mubr.msk.f32.mxu1 %vm2877_vm0, %v2876_v0 }
 0x247   :  { %2130 = vmatprep.subr.mxu1 %v2876_v0 }
 0x249   :  { %2112 = vmatmul.mubr.msk.bf16.vlgmr.msra.gmra.mxu0 %vm979_vm5, %v1093_v17  ;;  %v1520_v17 = vlaneseq }
 0x24a   :  { %2122 = vmatpush3.xpose.msk.msra.mxu0 %vm1202_vm6, %v589_v19  ;;  %2131 = vmatpush3.xpose.msk.msra.mxu1 %vm1202_vm6, %v694_v20  ;;  %v1193_v19 = vld [vmem:[%s3323_s8] sm:$0xf] }
 0x24b   :  { %2123 = vmatprep.subr.mxu0 %v2876_v0  ;;  %2140 = vmatprep.subr.mxu1 %v2876_v0  ;;  %v1521_v18 = vshrl.u32 %v1520_v17, 7  ;;  %v3247_v20 = vunpack.c.l.bf16 %v1193_v19 }
 0x24c   :  { %2125 = vmatprep.mubr.msk.f32.mxu0 %vm2877_vm0, %v2876_v0 }
 0x24d   :  { %2133 = vmatmul.mubr.msk.f32.vlgmr.msra.gmra.mxu1 %vm1202_vm6, %v1282_v23  ;;  %v1522_v23 = vsub.s32 0, %v1521_v18  ;;  %v1674_v24 = vsub.s32 1, %v1521_v18 }
 0x24e   :  { %2124 = vmatpush3.xpose.msk.msra.mxu0 %vm1202_vm6, %v586_v28  ;;  %2141 = vmatpush3.xpose.msk.msra.mxu1 %vm1202_vm6, %v1439_v27  ;;  %v1195_v27 = vld [vmem:[%s3324_s29] sm:$0xf]  ;;  %v1975_v28 = vadd.f32 -1.0, %v3247_v20 }
 0x24f   :  { %2135 = vmatprep.subr.mxu0 %v2876_v0  ;;  %2142 = vmatprep.mubr.msk.f32.mxu1 %vm2877_vm0, %v2876_v0 }
 0x250   :  { %2151 = vmatprep.subr.bf16.mxu1 %v2876_v0  ;;  %v1198_v41 = vmul.f32 1e+30, %v1975_v28 }
 0x251   :  { %2126 = vmatmul.mubr.msk.f32.vlgmr.msra.gmra.mxu0 %vm1202_vm6, %v1201_v32  ;;  %2143 = vmatmul.mubr.msk.f32.vlgmr.msra.gmra.mxu1 %vm1202_vm6, %v3209_v31  ;;  %v3251_v32 = vunpack.c.l.bf16 %v1195_v27 }
 0x252   :  { %2136 = vmatpush3.xpose.msk.msra.mxu0 %vm1202_vm6, %v1362_v33  ;;  %2152 = vmatpush3.bf16.msra.mxu1 %v1623_v29 }
 0x253   :  { %2137 = vmatprep.mubr.msk.f32.mxu0 %vm2877_vm0, %v2876_v0  ;;  %2145 = vmatprep.subr.bf16.mxu0 %v2876_v0 }
 0x254   :  { %2153 = vmatprep.mubr.msk.bf16.mxu1 %vm2877_vm0, %v2876_v0  ;;  %2163 = vmatprep.subr.bf16.mxu1 %v2876_v0 }
 0x255   :  { %2138 = vmatmul.mubr.msk.f32.vlgmr.msra.gmra.mxu0 %vm1202_vm6, %v3209_v31 }
 0x256   :  { %2146 = vmatpush3.bf16.msra.mxu0 %v3226_v34  ;;  %2147 = vmatprep.mubr.msk.bf16.mxu0 %vm2877_vm0, %v2876_v0 }
 0x257   :  { %2157 = vmatprep.subr.bf16.mxu0 %v2876_v0 }
 0x2f2   :  { %v1079_v43 = vpop.f32.mrf.mxu1 }
 0x2f3   :  { %v1086_v44 = vadd.f32 %v1079_v43, %v534_v42  ;;  %v1976_v42 = vadd.f32 -1.0, %v3251_v32 }
 0x2f4   :  { %v2107_v45 = vpop.f32.mrf.mxu1 }
 0x2f5   :  { %v1088_v47 = vmax.f32 %v1086_v44, 0.0  ;;  %v1200_v52 = vmul.f32 1e+30, %v1976_v42 }
 0x2f6   :  { %v1082_v48 = vpop.f32.mrf.mxu1 }
 0x2f7   :  { %1090 = vst.msk [vmem:[#allocation38] sm:$0xff] %vm495_vm3, %v1088_v47  ;;  %v1087_v49 = vadd.f32 %v1082_v48, %v537_v46 }
 0x2f8   :  { %v2108_v50 = vpop.f32.mrf.mxu1 }
 0x2f9   :  { %v1089_v51 = vmax.f32 %v1087_v49, 0.0 }
 0x2fb   :  { %1092 = vst.msk [vmem:[#allocation38 + $0x8] sm:$0xf] %vm1091_vm7, %v1089_v51 }
 0x301   :  { %v1021_v54 = vpop.f32.mrf.mxu0 }
 0x302   :  { %v1028_v22 = vadd.f32 %v1021_v54, %v469_v53 }
 0x303   :  { %v2101_v55 = vpop.f32.mrf.mxu0 }
 0x304   :  { %v1030_v57 = vmax.f32 %v1028_v22, 0.0 }
 0x305   :  { %v1024_v58 = vpop.f32.mrf.mxu0  ;;  %v1184_v59 = vpop.f32.mrf.mxu1 }
 0x306   :  { %1032 = vst.msk [vmem:[#allocation37] sm:$0xff] %vm495_vm3, %v1030_v57  ;;  %v1029_v60 = vadd.f32 %v1024_v58, %v472_v56 }
 0x307   :  { %v2102_v61 = vpop.f32.mrf.mxu0  ;;  %v2119_v62 = vpop.f32.mrf.mxu1 }
 0x308   :  { %v1031_v1 = vmax.f32 %v1029_v60, 0.0 }
 0x309   :  { %v1135_v2 = vpop.f32.mrf.mxu0  ;;  %v1187_v3 = vpop.f32.mrf.mxu1 }
 0x30a   :  { %1033 = vst.msk [vmem:[#allocation37 + $0x8] sm:$0xff] %vm495_vm3, %v1031_v1  ;;  %v1141_v21 = vadd.f32 %v1135_v2, %v966_v63 }
 0x30b   :  { %v2113_v4 = vpop.f32.mrf.mxu0  ;;  %v2120_v5 = vpop.f32.mrf.mxu1 }
 0x30c   :  { %v1190_v6 = vadd.f32 %v1184_v59, %v1141_v21 }
 0x30d   :  { %v1138_v25 = vpop.f32.mrf.mxu0  ;;  %v1358_v7 = vpop.f32.mrf.mxu1 }
 0x30e   :  { %v1191_v8 = vmax.f32 %v1190_v6, 0.0  ;;  %v1552_v40 = vrot.slane %v1358_v7, %v1522_v23 }
 0x30f   :  { %v2114_v9 = vpop.f32.mrf.mxu0  ;;  %v2134_v10 = vpop.f32.mrf.mxu1 }
 0x310   :  { %1192 = vst.msk [vmem:[#allocation41] sm:$0xf] %vm1091_vm7, %v1191_v8 }
 0x311   :  { %v1278_v11 = vpop.f32.mrf.mxu0  ;;  %v1509_v12 = vpop.f32.mrf.mxu1 }
 0x312   :  { %v1523_v33 = vrot.slane %v1278_v11, %v1522_v23  ;;  %v1675_v29 = vrot.slane %v1278_v11, %v1674_v24 }
 0x313   :  { %v2127_v13 = vpop.f32.mrf.mxu0  ;;  %v2144_v14 = vpop.f32.mrf.mxu1 }
 0x315   :  { %v1435_v15 = vpop.f32.mrf.mxu0 }
 0x316   :  { %1669 = vperm.xlu1 %2241, %v1435_v15   ;;  %1517 = vperm.xlu0 %2240, %v1435_v15  }
 0x317   :  { %v2139_v16 = vpop.f32.mrf.mxu0 }
 0x31a   :  { %1697 = vperm.xlu1 %2241, %v1509_v12   ;;  %1546 = vperm.xlu0 %2240, %v1509_v12  }
 0x31e   :  { %2242 = vset.pattern.permute.xlu0 %v2878_v39  ;;  %v1703_v39 = vrot.slane %v1358_v7, %v1674_v24 }
 0x391   :  { %v1670_v35 = vpop.permute.xlu1 %1669  ;;  %v1518_v36 = vpop.permute.xlu0 %1517 }
 0x392   :  { %v1676_v37 = vadd.f32 %v1675_v29, %v1670_v35  ;;  %v1524_v38 = vadd.f32 %v1523_v33, %v1518_v36 }
 0x394   :  { %vm1677_vm8 = vcmp.gt.f32.partialorder %v1676_v37, 0.0  ;;  %v1678_v43 = vmul.f32 0.2, %v1676_v37  ;;  %vm1525_vm9 = vcmp.gt.f32.partialorder %v1524_v38, 0.0  ;;  %v1526_v44 = vmul.f32 0.2, %v1524_v38 }
 0x395   :  { %v1698_v45 = vpop.permute.xlu1 %1697  ;;  %v1547_v46 = vpop.permute.xlu0 %1546 }
 0x396   :  { %v1704_v47 = vadd.f32 %v1703_v39, %v1698_v45  ;;  %v1553_v48 = vadd.f32 %v1552_v40, %v1547_v46  ;;  %v1527_v49 = vsel %vm1525_vm9, %v1524_v38, %v1526_v44  ;;  %v1679_v50 = vsel %vm1677_vm8, %v1676_v37, %v1678_v43 }
 0x397   :  { %v1528_v51 = vadd.f32 %v1527_v49, %v1198_v41  ;;  %v1680_v55 = vadd.f32 %v1679_v50, %v1198_v41 }
 0x398   :  { %vm1705_vm10 = vcmp.gt.f32.partialorder %v1704_v47, 0.0  ;;  %v1706_v53 = vmul.f32 0.2, %v1704_v47  ;;  %vm1554_vm11 = vcmp.gt.f32.partialorder %v1553_v48, 0.0  ;;  %v1555_v54 = vmul.f32 0.2, %v1553_v48 }
 0x399   :  { %v1529_v22 = vsel %vm495_vm3, %v1528_v51, -inf  ;;  %v1681_v58 = vsel %vm495_vm3, %v1680_v55, -inf }
 0x39a   :  { %1530 = vmax.xlane.f32.xlu0 %v1529_v22  ;;  %v1556_v56 = vsel %vm1554_vm11, %v1553_v48, %v1555_v54  ;;  %v1707_v57 = vsel %vm1705_vm10, %v1704_v47, %v1706_v53 }
 0x39b   :  { %v1557_v26 = vadd.f32 %v1556_v56, %v1200_v52  ;;  %v1708_v60 = vadd.f32 %v1707_v57, %v1200_v52 }
 0x39d   :  { %v1558_v59 = vsel %vm979_vm5, %v1557_v26, -inf  ;;  %v1709_v61 = vsel %vm979_vm5, %v1708_v60, -inf }
 0x39e   :  { %1682 = vmax.xlane.f32.xlu0 %v1681_v58  ;;  %1559 = vmax.xlane.f32.xlu1 %v1558_v59 }
 0x3a2   :  { %1710 = vmax.xlane.f32.xlu0 %v1709_v61 }
 0x423   :  { %v1531_v62 = vpop.xlane.xlu0 %1530 }
 0x424   :  { %v1532_v63 = vsub.f32 %v1528_v51, %v1531_v62 }
 0x426   :  { %v1533_v1 = vmul.f32 1.442695, %v1532_v63 }
 0x427   :  { %v1560_v2 = vpop.xlane.xlu1 %1559  ;;  %v1683_v3 = vpop.xlane.xlu0 %1682 }
 0x428   :  { %2251 = vpow2.f32 %v1533_v1  ;;  %v1561_v21 = vsub.f32 %v1557_v26, %v1560_v2  ;;  %v1684_v4 = vsub.f32 %v1680_v55, %v1683_v3 }
 0x42a   :  { %v1562_v5 = vmul.f32 1.442695, %v1561_v21  ;;  %v1685_v6 = vmul.f32 1.442695, %v1684_v4 }
 0x42b   :  { %v1711_v25 = vpop.xlane.xlu0 %1710 }
 0x42c   :  { %2253 = vpow2.f32 %v1562_v5  ;;  %v1712_v7 = vsub.f32 %v1708_v60, %v1711_v25 }
 0x42d   :  { %2255 = vpow2.f32 %v1685_v6 }
 0x42e   :  { %v1713_v8 = vmul.f32 1.442695, %v1712_v7 }
 0x430   :  { %2257 = vpow2.f32 %v1713_v8 }
 0x435   :  { %v2252_v9 = vpop.eup %2251 }
 0x436   :  { %v1535_v10 = vmul.f32 %v2252_v9, %v3247_v20 }
 0x438   :  { %v1536_v11 = vsel %vm495_vm3, %v1535_v10, 0.0 }
 0x439   :  { %v2254_v12 = vpop.eup %2253  ;;  %1537 = vadd.xlane.f32.xlu1 %v1536_v11 }
 0x43a   :  { %v2256_v13 = vpop.eup %2255  ;;  %v1564_v14 = vmul.f32 %v2254_v12, %v3251_v32 }
 0x43b   :  { %v1687_v15 = vmul.f32 %v2256_v13, %v3247_v20 }
 0x43c   :  { %v1565_v16 = vsel %vm979_vm5, %v1564_v14, 0.0 }
 0x43d   :  { %v2258_v17 = vpop.eup %2257  ;;  %1566 = vadd.xlane.f32.xlu0 %v1565_v16  ;;  %v1688_v18 = vsel %vm495_vm3, %v1687_v15, 0.0 }
 0x43e   :  { %1689 = vadd.xlane.f32.xlu1 %v1688_v18  ;;  %v1715_v19 = vmul.f32 %v2258_v17, %v3251_v32 }
 0x440   :  { %v1716_v23 = vsel %vm979_vm5, %v1715_v19, 0.0 }
 0x441   :  { %1717 = vadd.xlane.f32.xlu0 %v1716_v23 }
 0x44f   :  { %1726 = vrot.lane.b32.xlu1 %v3226_v34, %s2880_s12 }
 0x457   :  { %1779 = vrot.lane.b32.xlu0 %v3206_v30, %s2880_s12 }
 0x4c2   :  { %v1538_v24 = vpop.xlane.xlu1 %1537 }
 0x4c3   :  { %vm1539_vm12 = vcmp.eq.f32.partialorder %v1538_v24, 0.0 }
 0x4c4   :  { %v1540_v20 = vsel %vm1539_vm12, 1.0, %v1538_v24 }
 0x4c5   :  { %2259 = vrcp.f32 %v1540_v20 }
 0x4c6   :  { %v1567_v27 = vpop.xlane.xlu0 %1566 }
 0x4c7   :  { %v1690_v28 = vpop.xlane.xlu1 %1689  ;;  %vm1568_vm13 = vcmp.eq.f32.partialorder %v1567_v27, 0.0 }
 0x4c8   :  { %vm1691_vm14 = vcmp.eq.f32.partialorder %v1690_v28, 0.0  ;;  %v1569_v33 = vsel %vm1568_vm13, 1.0, %v1567_v27 }
 0x4c9   :  { %v1692_v29 = vsel %vm1691_vm14, 1.0, %v1690_v28  ;;  %2261 = vrcp.f32 %v1569_v33 }
 0x4ca   :  { %2263 = vrcp.f32 %v1692_v29  ;;  %v1718_v32 = vpop.xlane.xlu0 %1717 }
 0x4cb   :  { %vm1719_vm15 = vcmp.eq.f32.partialorder %v1718_v32, 0.0  ;;  %v1727_v40 = vpop.permute.xlu1 %1726 }
 0x4cc   :  { %v1720_v35 = vsel %vm1719_vm15, 1.0, %v1718_v32 }
 0x4cd   :  { %2265 = vrcp.f32 %v1720_v35 }
 0x4ce   :  { %v1780_v41 = vpop.permute.xlu0 %1779 }
 0x4cf   :  { %v1785_v45 = vsel %vm983_vm4, %v1780_v41, 0 }
 0x4d2   :  { %v2260_v36 = vpop.eup %2259 }
 0x4d3   :  { %v1543_v34 = vmul.f32 %v2260_v36, %v1535_v10 }
 0x4d5   :  { %v1573_v37 = vpack.c.bf16 %v1543_v34, %v1543_v34 }
 0x4d6   :  { %v2262_v30 = vpop.eup %2261 }
 0x4d7   :  { %v2264_v38 = vpop.eup %2263  ;;  %2148 = vmatmul.mubr.msk.bf16.vlgmr.msra.gmra.mxu0 %vm495_vm3, %v1573_v37  ;;  %v1572_v39 = vmul.f32 %v2262_v30, %v1564_v14 }
 0x4d8   :  { %2158 = vmatpush3.bf16.msra.mxu0 %v1727_v40  ;;  %2159 = vmatprep.mubr.msk.bf16.mxu0 %vm2877_vm0, %v2876_v0  ;;  %v1695_v43 = vmul.f32 %v2264_v38, %v1687_v15 }
 0x4d9   :  { %v1618_v42 = vpack.c.bf16 %v1572_v39, %v1572_v39 }
 0x4da   :  { %v2266_v44 = vpop.eup %2265  ;;  %v1724_v46 = vpack.c.bf16 %v1695_v43, %v1695_v43 }
 0x4db   :  { %2154 = vmatmul.mubr.msk.bf16.vlgmr.msra.gmra.mxu1 %vm979_vm5, %v1618_v42  ;;  %v1723_v47 = vmul.f32 %v2266_v44, %v1715_v19 }
 0x4dc   :  { %2164 = vmatpush3.bf16.msra.mxu1 %v1785_v45  ;;  %2165 = vmatprep.mubr.msk.bf16.mxu1 %vm2877_vm0, %v2876_v0 }
 0x4dd   :  { %v1777_v48 = vpack.c.bf16 %v1723_v47, %v1723_v47 }
 0x4df   :  { %2160 = vmatmul.mubr.msk.bf16.vlgmr.msra.gmra.mxu0 %vm495_vm3, %v1724_v46 }
 0x4e3   :  { %2166 = vmatmul.mubr.msk.bf16.vlgmr.msra.gmra.mxu1 %vm979_vm5, %v1777_v48 }
 0x597   :  { %v1611_v49 = vpop.f32.mrf.mxu0 }
 0x598   :  { %v1617_v51 = vadd.f32 %v1611_v49, %v3209_v31 }
 0x599   :  { %v2149_v50 = vpop.f32.mrf.mxu0 }
 0x59b   :  { %v1614_v52 = vpop.f32.mrf.mxu0  ;;  %v1659_v53 = vpop.f32.mrf.mxu1 }
 0x59c   :  { %v1665_v54 = vadd.f32 %v1659_v53, %v1617_v51 }
 0x59d   :  { %v2150_v0 = vpop.f32.mrf.mxu0  ;;  %v2155_v22 = vpop.f32.mrf.mxu1 }
 0x59e   :  { %2718 = shalt.err (!%p2715_p2)
}
 0x59f   :  { %s2883_s13 = smov 128   ;;  %s2884_s23 = smov 8   ;;  %v1666_v55 = vmax.f32 %v1665_v54, 0.0 }
 0x5a0   :  { %1858 = dma.vmem_to_hbm [thread:$0]  %s1853_s19, 256, %s3071_s20, [#allocation39], %s2883_s13, %s2883_s13, %s2884_s23  }
 0x5a1   :  { %s2727_s21 = scalar_lea.vmem %s1841_s18, 256  ;;  %p2732_p4 = scmp.lt.s32.totalorder %s1841_s18, %s1841_s18 }
 0x5a2   :  { %p2728_p3 = scmp.ne.s32.totalorder %s1841_s18, %s2727_s21  ;;  %p2733_p5 = scmp.lt.s32.totalorder %s2727_s21, %s2727_s21 }
 0x5a4   :  { %p2734_p6 = por %p2733_p5, %p2732_p4 }
 0x5a6   :  { %p2735_p7 = pnand %p2734_p6, %p2728_p3 }
 0x5a8   :  { %2738 = shalt.err (!%p2735_p7)
}
 0x5a9   :  { %1846 = dma.vmem_to_hbm [thread:$0]  %s1841_s18, 256, %s3066_s5, [#allocation4], %s2883_s13, %s2883_s13, %s2884_s23   ;;  %v1662_v56 = vpop.f32.mrf.mxu1  ;;  %v1766_v57 = vpop.f32.mrf.mxu0  ;;  %1667 = vst.msk [vmem:[#allocation40] sm:$0xff] %vm495_vm3, %v1666_v55 }
 0x5aa   :  { %s2885_s26 = smov 16   ;;  %s2886_s6 = smov [#allocation41]  }
 0x5ab   :  { %1773 = vrot.lane.b32.xlu1 %v1766_v57, %s2885_s26  ;;  %s1875_s28 = sshll.u32 %s2886_s6, 4  ;;  %v2156_v26 = vpop.f32.mrf.mxu1  ;;  %v2161_v58 = vpop.f32.mrf.mxu0  ;;  %s1876_s28 = int_to_ptr.vmem [resolvable:$true] %s1875_s28 }
 0x5ac   :  { %s2747_s20 = scalar_lea.vmem %s1876_s28, 64  ;;  %p2752_p9 = scmp.lt.s32.totalorder %s1876_s28, %s1876_s28 }
 0x5ad   :  { %p2748_p8 = scmp.ne.s32.totalorder %s1876_s28, %s2747_s20  ;;  %p2753_p10 = scmp.lt.s32.totalorder %s2747_s20, %s2747_s20 }
 0x5af   :  { %p2754_p11 = por %p2753_p10, %p2752_p9 }
 0x5b1   :  { %p2755_p12 = pnand %p2754_p11, %p2748_p8 }
 0x5b3   :  { %2758 = shalt.err (!%p2755_p12)
}
 0x5b4   :  { %1878 = dma.vmem_to_hbm [thread:$0]  %s1876_s28, 64, %s3081_s24, [#allocation42]   ;;  %v1769_v59 = vpop.f32.mrf.mxu0  ;;  %v1821_v60 = vpop.f32.mrf.mxu1  ;;  %vm1833_vm0 = vcmask 261248  }
 0x5b5   :  { %1828 = vrot.lane.b32.xlu1 %v1821_v60, %s2885_s26  ;;  %s2887_s5 = smov [#allocation40]  }
 0x5b6   :  { %v2162_v61 = vpop.f32.mrf.mxu0  ;;  %v2167_v62 = vpop.f32.mrf.mxu1  ;;  %s1865_s4 = sshll.u32 %s2887_s5, 4  ;;  %s1866_s4 = int_to_ptr.vmem [resolvable:$true] %s1865_s4 }
 0x5b7   :  { %s2767_s1 = scalar_lea.vmem %s1866_s4, 128  ;;  %p2772_p0 = scmp.lt.s32.totalorder %s1866_s4, %s1866_s4 }
 0x5b8   :  { %v1824_v63 = vpop.f32.mrf.mxu1  ;;  %p2768_p13 = scmp.ne.s32.totalorder %s1866_s4, %s2767_s1  ;;  %p2773_p1 = scmp.lt.s32.totalorder %s2767_s1, %s2767_s1 }
 0x5ba   :  { %v2168_v1 = vpop.f32.mrf.mxu1  ;;  %p2774_p2 = por %p2773_p1, %p2772_p0 }
 0x5bc   :  { %p2775_p3 = pnand %p2774_p2, %p2768_p13 }
 0x61d   :  { %v1774_v2 = vpop.permute.xlu1 %1773 }
 0x61e   :  { %v1776_v3 = vadd.f32 %v1774_v2, %v3209_v31 }
 0x627   :  { %v1829_v21 = vpop.permute.xlu1 %1828 }
 0x628   :  { %v1831_v4 = vadd.f32 %v1829_v21, %v1776_v3 }
 0x62a   :  { %v1832_v5 = vmax.f32 %v1831_v4, 0.0 }
 0x62c   :  { %1834 = vst.msk [vmem:[#allocation40] sm:$0xff] %vm1833_vm0, %v1832_v5 }
 0x62d   :  { %2778 = shalt.err (!%p2775_p3)
}
 0x62e   :  { %1868 = dma.vmem_to_hbm [thread:$0]  %s1866_s4, 128, %s3076_s27, [#allocation39]  }
 0x62f   :  { %2811 = dma.done.wait [#allocation4], 256  }
 0x630   :  { %2812 = vsyncadd [#allocation4], 4294967040 }
 0x631   :  { %2813 = dma.done.wait [#allocation39], 384  }
 0x632   :  { %2814 = vsyncadd [#allocation39], 4294966912 }
 0x633   :  { %2815 = dma.done.wait [#allocation42], 64  }
 0x634   :  { %2816 = vsyncadd [#allocation42], 4294967232 }
 0x635   :  { %1891 = vsyncpa [#allocation3], 1 }
 0x636   :  { %1892 = vsyncpa [#allocation6], 1 }
 0x637   :  { %1893 = vsyncpa [#allocation9], 1 }
 0x638   :  { %1894 = vsyncpa [#allocation12], 1 }
 0x639   :  { %1895 = vsyncpa [#allocation15], 1 }
 0x63a   :  { %1896 = vsyncpa [#allocation18], 1 }
 0x63b   :  { %1897 = vsyncpa [#allocation21], 1 }
 0x63c   :  { %1898 = vsyncpa [#allocation24], 1 }
 0x63d   :  { %1899 = vsyncpa [#allocation27], 1 }
 0x63e   :  { %1900 = vsyncpa [#allocation30], 1 }
 0x63f   :  { %1901 = vsyncpa [#allocation33], 1 }
 0x640   :  { %1902 = vsyncpa [#allocation36], 1 }
 0x641   :  { %1903 = vsyncpa [#allocation4], 1 }
 0x642   :  { %1904 = vsyncpa [#allocation39], 1 }
 0x643   :  { %1905 = vsyncpa [#allocation42], 1 }

</bundles_post_ra>
